<compile_context>
chip_gen: v5e
topology: v5e:2x2
jax: 0.10.0
libtpu: 0.0.40
codegen_flags: <defaults>
</compile_context>

<pallas_src>
import functools

import numpy as np
import jax
import jax.numpy as jnp
from jax.experimental import pallas as pl
from jax.experimental.pallas import tpu as pltpu


# ----------------------------------------------------------------------------
# Fused Pallas kernel: conv1 + ReLU + pool1 + conv2 + ReLU + pool2 + dense
# ----------------------------------------------------------------------------
def cnn2_fused_kernel(p_ref, w1_ref, p1t_ref, g_ref, wpd_ref, out_ref):
    # p_ref   : (Bt, CK1, HW1)  bf16  stage-1 im2col patches (features x spatial)
    # w1_ref  : (C1, 1, CK1)    bf16  conv1 weights, one row per output channel
    # p1t_ref : (HW1, Q)        f32   adaptive-avg-pool-1 matrix, transposed
    # g_ref   : (C1, Q, F)      f32   pool1-output -> conv2-output map / channel
    # wpd_ref : (F, O)          f32   fold of pool2 + flatten + dense
    # out_ref : (Bt, 1, O)      f32   logits
    bt = p_ref.shape[0]
    n_c1 = w1_ref.shape[0]
    ck1 = p_ref.shape[1]
    hw1 = p_ref.shape[2]
    q = g_ref.shape[1]
    f = g_ref.shape[2]
    o = wpd_ref.shape[1]

    patches = p_ref[...]                                            # (Bt, CK1, HW1)
    p1t_b = jnp.broadcast_to(p1t_ref[...], (bt, hw1, q))            # (Bt, HW1, Q)
    wpd_b = jnp.broadcast_to(wpd_ref[...], (bt, f, o))              # (Bt, F, O)

    z = jnp.zeros((bt, 1, f), jnp.float32)
    for c in range(n_c1):                 # 4 conv1 output channels, static unroll
        w_c = jnp.broadcast_to(w1_ref[c], (bt, 1, ck1))             # (Bt, 1, CK1)
        # conv1 (bf16 x bf16 -> f32 accumulate) + ReLU
        a_c = jnp.einsum('bxk,bkh->bxh', w_c, patches,
                         preferred_element_type=jnp.float32)        # (Bt, 1, HW1)
        a_c = jnp.maximum(a_c, 0.0)
        # AdaptiveAvgPool2d((7,7)) as a matmul
        y_c = jnp.einsum('bxh,bhq->bxq', a_c, p1t_b,
                         preferred_element_type=jnp.float32)        # (Bt, 1, Q)
        # conv2 contribution of this input channel (im2col folded into g)
        g_b = jnp.broadcast_to(g_ref[c], (bt, q, f))                # (Bt, Q, F)
        z = z + jnp.einsum('bxq,bqf->bxf', y_c, g_b,
                           preferred_element_type=jnp.float32)      # (Bt, 1, F)

    r = jnp.maximum(z, 0.0)                                         # ReLU after conv2
    # pool2 + flatten + dense folded into one (F, O) matrix
    out_ref[...] = jnp.einsum('bxf,bfo->bxo', r, wpd_b,
                              preferred_element_type=jnp.float32)   # (Bt, 1, O)


def _cnn2_pallas(p, w1e, p1t, g, wpd, block_b):
    bpad, ck1, hw1 = p.shape
    n_c1 = w1e.shape[0]
    q, f = g.shape[1], g.shape[2]
    o = wpd.shape[1]
    nb = bpad // block_b
    return pl.pallas_call(
        cnn2_fused_kernel,
        out_shape=jax.ShapeDtypeStruct((bpad, 1, o), jnp.float32),
        grid_spec=pltpu.PrefetchScalarGridSpec(
            num_scalar_prefetch=0,
            grid=(nb,),
            in_specs=[
                pl.BlockSpec((block_b, ck1, hw1), lambda i: (i, 0, 0)),  # patches
                pl.BlockSpec((n_c1, 1, ck1), lambda i: (0, 0, 0)),       # conv1 w (resident)
                pl.BlockSpec((hw1, q), lambda i: (0, 0)),                # pool1 (resident)
                pl.BlockSpec((n_c1, q, f), lambda i: (0, 0, 0)),         # pool1∘conv2 (resident)
                pl.BlockSpec((f, o), lambda i: (0, 0)),                  # pool2∘dense (resident)
            ],
            out_specs=pl.BlockSpec((block_b, 1, o), lambda i: (i, 0, 0)),
        ),
        compiler_params=pltpu.CompilerParams(
            dimension_semantics=("parallel",),          # batch tiles -> v7x megacore
            vmem_limit_bytes=32 * 1024 * 1024,
        ),
    )(p, w1e, p1t, g, wpd)


# ----------------------------------------------------------------------------
# One-time parameter preparation (hoisted out of the per-forward path)
# ----------------------------------------------------------------------------
def adaptive_pool_matrix(in_size, out_size):
    """1-D AdaptiveAvgPool as a (out, in) matrix (PyTorch start/end rule)."""
    P = np.zeros((out_size, in_size), dtype=np.float32)
    for i in range(out_size):
        s = (i * in_size) // out_size
        e = -((-(i + 1) * in_size) // out_size)
        P[i, s:e] = 1.0 / (e - s)
    return P


def prepare_params(w1, w2, wd, image_hw):
    """w1:(4,3,5,5), w2:(12,4,5,5), wd:(10,588); image_hw = (H, W)."""
    H, W = image_hw
    H1, W1 = H + 2 - 5 + 1, W + 2 - 5 + 1            # conv1: k=5, pad=1, stride=1

    # conv1 weights as (C1, 1, CK1) rows, bf16 for the MXU
    w1e = jnp.asarray(np.asarray(w1, np.float32).reshape(4, 1, 3 * 25),
                      dtype=jnp.bfloat16)

    # AdaptiveAvgPool2d((7,7)) on the conv1 output, transposed: (H1*W1, 49)
    P1 = np.kron(adaptive_pool_matrix(H1, 7), adaptive_pool_matrix(W1, 7))
    p1t = jnp.asarray(P1.T.astype(np.float32))

    # Fold stage-2 im2col (7x7 input, pad=1, k=5 -> 5x5 output) with conv2
    # weights, per conv2 INPUT channel:  g[ci, q, q5*12+co]
    E = np.zeros((49, 25, 25), np.float32)           # (y1 position, out pos, kernel pos)
    for oh in range(5):
        for ow in range(5):
            for ki in range(5):
                for kj in range(5):
                    ih, iw = oh + ki - 1, ow + kj - 1
                    if 0 <= ih < 7 and 0 <= iw < 7:
                        E[ih * 7 + iw, oh * 5 + ow, ki * 5 + kj] = 1.0
    w2r = np.asarray(w2, np.float32).reshape(12, 4, 25)          # (co, ci, kk)
    G = np.einsum('qsk,ock->cqso', E, w2r).reshape(4, 49, 25 * 12)
    g = jnp.asarray(G)

    # Fold pool2 (5x5 -> 7x7) + flatten (channel-major) + dense: (300, 10)
    P2 = np.kron(adaptive_pool_matrix(5, 7), adaptive_pool_matrix(5, 7))  # (49, 25)
    wd3 = np.asarray(wd, np.float32).reshape(10, 12, 49)                  # (o, co, q7)
    Wpd = np.einsum('ts,oct->sco', P2, wd3).reshape(25 * 12, 10)
    wpd = jnp.asarray(Wpd)

    return dict(w1e=w1e, p1t=p1t, g=g, wpd=wpd)


# ----------------------------------------------------------------------------
# Forward wrapper
# ----------------------------------------------------------------------------
def cnn2_forward(x, params, block_b=8):
    """x: (B, 3, H, W) NCHW float32 -> (B, 10) logits."""
    B, C, H, W = x.shape
    H1, W1 = H + 2 - 5 + 1, W + 2 - 5 + 1
    assert params['p1t'].shape[0] == H1 * W1, "params prepared for a different image size"

    # stage-1 im2col directly in (B, C*k*k, H1*W1) layout (no transpose).
    xp = jnp.pad(x, ((0, 0), (0, 0), (1, 1), (1, 1)))
    cols = [xp[:, :, ki:ki + H1, kj:kj + W1] for ki in range(5) for kj in range(5)]
    p = jnp.stack(cols, axis=2).reshape(B, C * 25, H1 * W1).astype(jnp.bfloat16)

    bt = max(1, min(block_b, B))
    nb = -(-B // bt)
    bpad = nb * bt
    if bpad != B:
        p = jnp.pad(p, ((0, bpad - B), (0, 0), (0, 0)))

    out = _cnn2_pallas(p, params['w1e'], params['p1t'], params['g'], params['wpd'], bt)
    return out[:B, 0, :]


# ----------------------------------------------------------------------------
# Pure-JAX reference (mirrors the PyTorch module) for a correctness check
# ----------------------------------------------------------------------------
def reference(x, w1, w2, wd):
    def conv(y, w):
        return jax.lax.conv_general_dilated(
            y, w, (1, 1), [(1, 1), (1, 1)],
            dimension_numbers=("NCHW", "OIHW", "NCHW"))

    def pool(y):
        Ph = jnp.asarray(adaptive_pool_matrix(y.shape[2], 7))
        Pw = jnp.asarray(adaptive_pool_matrix(y.shape[3], 7))
        return jnp.einsum("oh,bchw,pw->bcop", Ph, y, Pw)

    y = pool(jnp.maximum(conv(x, w1), 0.0))
    y = pool(jnp.maximum(conv(y, w2), 0.0))
    return y.reshape(y.shape[0], -1) @ wd.T


# ----------------------------------------------------------------------------
if __name__ == "__main__":
    key = jax.random.PRNGKey(0)
    k1, k2, k3, kx = jax.random.split(key, 4)

    # Deterministic synthetic parameters (shapes from CNN2Model.__init__)
    w1 = jax.random.normal(k1, (4, 3, 5, 5), jnp.float32) * 0.1       # conv1, no bias
    w2 = jax.random.normal(k2, (12, 4, 5, 5), jnp.float32) * 0.1      # conv2, no bias
    wd = jax.random.normal(k3, (10, 12 * 7 * 7), jnp.float32) * 0.05  # dense1, no bias

    x = jax.random.normal(kx, (2, 3, 16, 16), jnp.float32)            # NCHW input

    params = prepare_params(w1, w2, wd, image_hw=(16, 16))            # one-time prep
    fwd = jax.jit(functools.partial(cnn2_forward, block_b=8))

    out = jax.block_until_ready(fwd(x, params))
    ref = jax.block_until_ready(reference(x, w1, w2, wd))

    assert out.shape == (2, 10)
    np.testing.assert_allclose(np.asarray(out), np.asarray(ref), rtol=3e-2, atol=3e-2)
    print("KERNEL_OK")
</pallas_src>

<mosaic_0001>
module attributes {stable_mosaic.version = 11 : i64} {
  func.func @cnn2_fused_kernel(%arg0: i32, %arg1: memref<2x75x196xbf16, #tpu.memory_space<vmem>>, %arg2: memref<4x1x75xbf16, #tpu.memory_space<vmem>>, %arg3: memref<196x49xf32, #tpu.memory_space<vmem>>, %arg4: memref<4x49x300xf32, #tpu.memory_space<vmem>>, %arg5: memref<300x10xf32, #tpu.memory_space<vmem>>, %arg6: memref<2x1x10xf32, #tpu.memory_space<vmem>>) attributes {dimension_semantics = [#tpu.dimension_semantics<parallel>], iteration_bounds = array<i64: 1>, scalar_prefetch = 0 : i64, scratch_operands = 0 : i64, tpu.core_type = #tpu.core_type<tc>, window_params = [{transform_indices = @transform_0, window_bounds = array<i64: 2, 75, 196>}, {pipeline_mode = #tpu.pipeline_mode<synchronous>, transform_indices = @transform_1, window_bounds = array<i64: 4, 1, 75>}, {pipeline_mode = #tpu.pipeline_mode<synchronous>, transform_indices = @transform_2, window_bounds = array<i64: 196, 49>}, {pipeline_mode = #tpu.pipeline_mode<synchronous>, transform_indices = @transform_3, window_bounds = array<i64: 4, 49, 300>}, {pipeline_mode = #tpu.pipeline_mode<synchronous>, transform_indices = @transform_4, window_bounds = array<i64: 300, 10>}, {transform_indices = @transform_5, window_bounds = array<i64: 2, 1, 10>}]} {
    %c0 = arith.constant 0 : index
    %c0_0 = arith.constant 0 : index
    %c0_1 = arith.constant 0 : index
    %0 = vector.load %arg1[%c0, %c0_0, %c0_1] : memref<2x75x196xbf16, #tpu.memory_space<vmem>>, vector<2x75x196xbf16>
    %c0_2 = arith.constant 0 : index
    %c0_3 = arith.constant 0 : index
    %1 = vector.load %arg3[%c0_2, %c0_3] : memref<196x49xf32, #tpu.memory_space<vmem>>, vector<196x49xf32>
    %2 = vector.shape_cast %1 : vector<196x49xf32> to vector<1x196x49xf32>
    %3 = vector.broadcast %2 : vector<1x196x49xf32> to vector<2x196x49xf32>
    %c0_4 = arith.constant 0 : index
    %c0_5 = arith.constant 0 : index
    %4 = vector.load %arg5[%c0_4, %c0_5] : memref<300x10xf32, #tpu.memory_space<vmem>>, vector<300x10xf32>
    %5 = vector.shape_cast %4 : vector<300x10xf32> to vector<1x300x10xf32>
    %6 = vector.broadcast %5 : vector<1x300x10xf32> to vector<2x300x10xf32>
    %cst = arith.constant 0.000000e+00 : f32
    %7 = vector.broadcast %cst : f32 to vector<2x1x300xf32>
    %c0_6 = arith.constant 0 : index
    %c0_7 = arith.constant 0 : index
    %c0_8 = arith.constant 0 : index
    %8 = vector.load %arg2[%c0_6, %c0_7, %c0_8] : memref<4x1x75xbf16, #tpu.memory_space<vmem>>, vector<1x1x75xbf16>
    %9 = vector.shape_cast %8 : vector<1x1x75xbf16> to vector<1x75xbf16>
    %10 = vector.shape_cast %9 : vector<1x75xbf16> to vector<1x1x75xbf16>
    %11 = vector.broadcast %10 : vector<1x1x75xbf16> to vector<2x1x75xbf16>
    "tpu.trace_start"() <{level = 10 : i32, message = "bxk,bkh->bxh"}> : () -> ()
    %cst_9 = arith.constant dense<0.000000e+00> : vector<2x1x196xf32>
    %12 = tpu.matmul %11, %0, %cst_9 {dimension_numbers = #tpu.dot_dimension_numbers<[2], [1], [1], [2], [0, 0, 0, 1, 1, 2], [0], [0]>} : vector<2x1x75xbf16>, vector<2x75x196xbf16>, vector<2x1x196xf32> -> vector<2x1x196xf32>
    "tpu.trace_stop"() : () -> ()
    %cst_10 = arith.constant 0.000000e+00 : f32
    %13 = vector.broadcast %cst_10 : f32 to vector<2x1x196xf32>
    %14 = arith.maximumf %12, %13 : vector<2x1x196xf32>
    "tpu.trace_start"() <{level = 10 : i32, message = "bxh,bhq->bxq"}> : () -> ()
    %cst_11 = arith.constant dense<0.000000e+00> : vector<2x1x49xf32>
    %15 = tpu.matmul %14, %3, %cst_11 {dimension_numbers = #tpu.dot_dimension_numbers<[2], [1], [1], [2], [0, 0, 0, 1, 1, 2], [0], [0]>} : vector<2x1x196xf32>, vector<2x196x49xf32>, vector<2x1x49xf32> -> vector<2x1x49xf32>
    "tpu.trace_stop"() : () -> ()
    %c0_12 = arith.constant 0 : index
    %c0_13 = arith.constant 0 : index
    %c0_14 = arith.constant 0 : index
    %16 = vector.load %arg4[%c0_12, %c0_13, %c0_14] : memref<4x49x300xf32, #tpu.memory_space<vmem>>, vector<1x49x300xf32>
    %17 = vector.shape_cast %16 : vector<1x49x300xf32> to vector<49x300xf32>
    %18 = vector.shape_cast %17 : vector<49x300xf32> to vector<1x49x300xf32>
    %19 = vector.broadcast %18 : vector<1x49x300xf32> to vector<2x49x300xf32>
    "tpu.trace_start"() <{level = 10 : i32, message = "bxq,bqf->bxf"}> : () -> ()
    %cst_15 = arith.constant dense<0.000000e+00> : vector<2x1x300xf32>
    %20 = tpu.matmul %15, %19, %cst_15 {dimension_numbers = #tpu.dot_dimension_numbers<[2], [1], [1], [2], [0, 0, 0, 1, 1, 2], [0], [0]>} : vector<2x1x49xf32>, vector<2x49x300xf32>, vector<2x1x300xf32> -> vector<2x1x300xf32>
    "tpu.trace_stop"() : () -> ()
    %21 = arith.addf %7, %20 : vector<2x1x300xf32>
    %c1 = arith.constant 1 : index
    %c0_16 = arith.constant 0 : index
    %c0_17 = arith.constant 0 : index
    %22 = vector.load %arg2[%c1, %c0_16, %c0_17] : memref<4x1x75xbf16, #tpu.memory_space<vmem>>, vector<1x1x75xbf16>
    %23 = vector.shape_cast %22 : vector<1x1x75xbf16> to vector<1x75xbf16>
    %24 = vector.shape_cast %23 : vector<1x75xbf16> to vector<1x1x75xbf16>
    %25 = vector.broadcast %24 : vector<1x1x75xbf16> to vector<2x1x75xbf16>
    "tpu.trace_start"() <{level = 10 : i32, message = "bxk,bkh->bxh"}> : () -> ()
    %cst_18 = arith.constant dense<0.000000e+00> : vector<2x1x196xf32>
    %26 = tpu.matmul %25, %0, %cst_18 {dimension_numbers = #tpu.dot_dimension_numbers<[2], [1], [1], [2], [0, 0, 0, 1, 1, 2], [0], [0]>} : vector<2x1x75xbf16>, vector<2x75x196xbf16>, vector<2x1x196xf32> -> vector<2x1x196xf32>
    "tpu.trace_stop"() : () -> ()
    %cst_19 = arith.constant 0.000000e+00 : f32
    %27 = vector.broadcast %cst_19 : f32 to vector<2x1x196xf32>
    %28 = arith.maximumf %26, %27 : vector<2x1x196xf32>
    "tpu.trace_start"() <{level = 10 : i32, message = "bxh,bhq->bxq"}> : () -> ()
    %cst_20 = arith.constant dense<0.000000e+00> : vector<2x1x49xf32>
    %29 = tpu.matmul %28, %3, %cst_20 {dimension_numbers = #tpu.dot_dimension_numbers<[2], [1], [1], [2], [0, 0, 0, 1, 1, 2], [0], [0]>} : vector<2x1x196xf32>, vector<2x196x49xf32>, vector<2x1x49xf32> -> vector<2x1x49xf32>
    "tpu.trace_stop"() : () -> ()
    %c1_21 = arith.constant 1 : index
    %c0_22 = arith.constant 0 : index
    %c0_23 = arith.constant 0 : index
    %30 = vector.load %arg4[%c1_21, %c0_22, %c0_23] : memref<4x49x300xf32, #tpu.memory_space<vmem>>, vector<1x49x300xf32>
    %31 = vector.shape_cast %30 : vector<1x49x300xf32> to vector<49x300xf32>
    %32 = vector.shape_cast %31 : vector<49x300xf32> to vector<1x49x300xf32>
    %33 = vector.broadcast %32 : vector<1x49x300xf32> to vector<2x49x300xf32>
    "tpu.trace_start"() <{level = 10 : i32, message = "bxq,bqf->bxf"}> : () -> ()
    %cst_24 = arith.constant dense<0.000000e+00> : vector<2x1x300xf32>
    %34 = tpu.matmul %29, %33, %cst_24 {dimension_numbers = #tpu.dot_dimension_numbers<[2], [1], [1], [2], [0, 0, 0, 1, 1, 2], [0], [0]>} : vector<2x1x49xf32>, vector<2x49x300xf32>, vector<2x1x300xf32> -> vector<2x1x300xf32>
    "tpu.trace_stop"() : () -> ()
    %35 = arith.addf %21, %34 : vector<2x1x300xf32>
    %c2 = arith.constant 2 : index
    %c0_25 = arith.constant 0 : index
    %c0_26 = arith.constant 0 : index
    %36 = vector.load %arg2[%c2, %c0_25, %c0_26] : memref<4x1x75xbf16, #tpu.memory_space<vmem>>, vector<1x1x75xbf16>
    %37 = vector.shape_cast %36 : vector<1x1x75xbf16> to vector<1x75xbf16>
    %38 = vector.shape_cast %37 : vector<1x75xbf16> to vector<1x1x75xbf16>
    %39 = vector.broadcast %38 : vector<1x1x75xbf16> to vector<2x1x75xbf16>
    "tpu.trace_start"() <{level = 10 : i32, message = "bxk,bkh->bxh"}> : () -> ()
    %cst_27 = arith.constant dense<0.000000e+00> : vector<2x1x196xf32>
    %40 = tpu.matmul %39, %0, %cst_27 {dimension_numbers = #tpu.dot_dimension_numbers<[2], [1], [1], [2], [0, 0, 0, 1, 1, 2], [0], [0]>} : vector<2x1x75xbf16>, vector<2x75x196xbf16>, vector<2x1x196xf32> -> vector<2x1x196xf32>
    "tpu.trace_stop"() : () -> ()
    %cst_28 = arith.constant 0.000000e+00 : f32
    %41 = vector.broadcast %cst_28 : f32 to vector<2x1x196xf32>
    %42 = arith.maximumf %40, %41 : vector<2x1x196xf32>
    "tpu.trace_start"() <{level = 10 : i32, message = "bxh,bhq->bxq"}> : () -> ()
    %cst_29 = arith.constant dense<0.000000e+00> : vector<2x1x49xf32>
    %43 = tpu.matmul %42, %3, %cst_29 {dimension_numbers = #tpu.dot_dimension_numbers<[2], [1], [1], [2], [0, 0, 0, 1, 1, 2], [0], [0]>} : vector<2x1x196xf32>, vector<2x196x49xf32>, vector<2x1x49xf32> -> vector<2x1x49xf32>
    "tpu.trace_stop"() : () -> ()
    %c2_30 = arith.constant 2 : index
    %c0_31 = arith.constant 0 : index
    %c0_32 = arith.constant 0 : index
    %44 = vector.load %arg4[%c2_30, %c0_31, %c0_32] : memref<4x49x300xf32, #tpu.memory_space<vmem>>, vector<1x49x300xf32>
    %45 = vector.shape_cast %44 : vector<1x49x300xf32> to vector<49x300xf32>
    %46 = vector.shape_cast %45 : vector<49x300xf32> to vector<1x49x300xf32>
    %47 = vector.broadcast %46 : vector<1x49x300xf32> to vector<2x49x300xf32>
    "tpu.trace_start"() <{level = 10 : i32, message = "bxq,bqf->bxf"}> : () -> ()
    %cst_33 = arith.constant dense<0.000000e+00> : vector<2x1x300xf32>
    %48 = tpu.matmul %43, %47, %cst_33 {dimension_numbers = #tpu.dot_dimension_numbers<[2], [1], [1], [2], [0, 0, 0, 1, 1, 2], [0], [0]>} : vector<2x1x49xf32>, vector<2x49x300xf32>, vector<2x1x300xf32> -> vector<2x1x300xf32>
    "tpu.trace_stop"() : () -> ()
    %49 = arith.addf %35, %48 : vector<2x1x300xf32>
    %c3 = arith.constant 3 : index
    %c0_34 = arith.constant 0 : index
    %c0_35 = arith.constant 0 : index
    %50 = vector.load %arg2[%c3, %c0_34, %c0_35] : memref<4x1x75xbf16, #tpu.memory_space<vmem>>, vector<1x1x75xbf16>
    %51 = vector.shape_cast %50 : vector<1x1x75xbf16> to vector<1x75xbf16>
    %52 = vector.shape_cast %51 : vector<1x75xbf16> to vector<1x1x75xbf16>
    %53 = vector.broadcast %52 : vector<1x1x75xbf16> to vector<2x1x75xbf16>
    "tpu.trace_start"() <{level = 10 : i32, message = "bxk,bkh->bxh"}> : () -> ()
    %cst_36 = arith.constant dense<0.000000e+00> : vector<2x1x196xf32>
    %54 = tpu.matmul %53, %0, %cst_36 {dimension_numbers = #tpu.dot_dimension_numbers<[2], [1], [1], [2], [0, 0, 0, 1, 1, 2], [0], [0]>} : vector<2x1x75xbf16>, vector<2x75x196xbf16>, vector<2x1x196xf32> -> vector<2x1x196xf32>
    "tpu.trace_stop"() : () -> ()
    %cst_37 = arith.constant 0.000000e+00 : f32
    %55 = vector.broadcast %cst_37 : f32 to vector<2x1x196xf32>
    %56 = arith.maximumf %54, %55 : vector<2x1x196xf32>
    "tpu.trace_start"() <{level = 10 : i32, message = "bxh,bhq->bxq"}> : () -> ()
    %cst_38 = arith.constant dense<0.000000e+00> : vector<2x1x49xf32>
    %57 = tpu.matmul %56, %3, %cst_38 {dimension_numbers = #tpu.dot_dimension_numbers<[2], [1], [1], [2], [0, 0, 0, 1, 1, 2], [0], [0]>} : vector<2x1x196xf32>, vector<2x196x49xf32>, vector<2x1x49xf32> -> vector<2x1x49xf32>
    "tpu.trace_stop"() : () -> ()
    %c3_39 = arith.constant 3 : index
    %c0_40 = arith.constant 0 : index
    %c0_41 = arith.constant 0 : index
    %58 = vector.load %arg4[%c3_39, %c0_40, %c0_41] : memref<4x49x300xf32, #tpu.memory_space<vmem>>, vector<1x49x300xf32>
    %59 = vector.shape_cast %58 : vector<1x49x300xf32> to vector<49x300xf32>
    %60 = vector.shape_cast %59 : vector<49x300xf32> to vector<1x49x300xf32>
    %61 = vector.broadcast %60 : vector<1x49x300xf32> to vector<2x49x300xf32>
    "tpu.trace_start"() <{level = 10 : i32, message = "bxq,bqf->bxf"}> : () -> ()
    %cst_42 = arith.constant dense<0.000000e+00> : vector<2x1x300xf32>
    %62 = tpu.matmul %57, %61, %cst_42 {dimension_numbers = #tpu.dot_dimension_numbers<[2], [1], [1], [2], [0, 0, 0, 1, 1, 2], [0], [0]>} : vector<2x1x49xf32>, vector<2x49x300xf32>, vector<2x1x300xf32> -> vector<2x1x300xf32>
    "tpu.trace_stop"() : () -> ()
    %63 = arith.addf %49, %62 : vector<2x1x300xf32>
    %cst_43 = arith.constant 0.000000e+00 : f32
    %64 = vector.broadcast %cst_43 : f32 to vector<2x1x300xf32>
    %65 = arith.maximumf %63, %64 : vector<2x1x300xf32>
    "tpu.trace_start"() <{level = 10 : i32, message = "bxf,bfo->bxo"}> : () -> ()
    %cst_44 = arith.constant dense<0.000000e+00> : vector<2x1x10xf32>
    %66 = tpu.matmul %65, %6, %cst_44 {dimension_numbers = #tpu.dot_dimension_numbers<[2], [1], [1], [2], [0, 0, 0, 1, 1, 2], [0], [0]>} : vector<2x1x300xf32>, vector<2x300x10xf32>, vector<2x1x10xf32> -> vector<2x1x10xf32>
    "tpu.trace_stop"() : () -> ()
    %c0_45 = arith.constant 0 : index
    %c0_46 = arith.constant 0 : index
    %c0_47 = arith.constant 0 : index
    %67 = vector.load %arg6[%c0_45, %c0_46, %c0_47] : memref<2x1x10xf32, #tpu.memory_space<vmem>>, vector<2x1x10xf32>
    tpu.vector_store %arg6[%c0_45, %c0_46, %c0_47], %66 {strides = array<i32>} : memref<2x1x10xf32, #tpu.memory_space<vmem>>, vector<2x1x10xf32>,
    return
  }
  func.func @transform_0(%arg0: i32) -> (i32, i32, i32) {
    %c0_i32 = arith.constant 0 : i32
    %c0_i32_0 = arith.constant 0 : i32
    %c0_i32_1 = arith.constant 0 : i32
    return %arg0, %c0_i32, %c0_i32_0 : i32, i32, i32
  }
  func.func @transform_1(%arg0: i32) -> (i32, i32, i32) {
    %c0_i32 = arith.constant 0 : i32
    %c0_i32_0 = arith.constant 0 : i32
    %c0_i32_1 = arith.constant 0 : i32
    %c0_i32_2 = arith.constant 0 : i32
    return %c0_i32, %c0_i32_0, %c0_i32_1 : i32, i32, i32
  }
  func.func @transform_2(%arg0: i32) -> (i32, i32) {
    %c0_i32 = arith.constant 0 : i32
    %c0_i32_0 = arith.constant 0 : i32
    %c0_i32_1 = arith.constant 0 : i32
    return %c0_i32, %c0_i32_0 : i32, i32
  }
  func.func @transform_3(%arg0: i32) -> (i32, i32, i32) {
    %c0_i32 = arith.constant 0 : i32
    %c0_i32_0 = arith.constant 0 : i32
    %c0_i32_1 = arith.constant 0 : i32
    %c0_i32_2 = arith.constant 0 : i32
    return %c0_i32, %c0_i32_0, %c0_i32_1 : i32, i32, i32
  }
  func.func @transform_4(%arg0: i32) -> (i32, i32) {
    %c0_i32 = arith.constant 0 : i32
    %c0_i32_0 = arith.constant 0 : i32
    %c0_i32_1 = arith.constant 0 : i32
    return %c0_i32, %c0_i32_0 : i32, i32
  }
  func.func @transform_5(%arg0: i32) -> (i32, i32, i32) {
    %c0_i32 = arith.constant 0 : i32
    %c0_i32_0 = arith.constant 0 : i32
    %c0_i32_1 = arith.constant 0 : i32
    return %arg0, %c0_i32, %c0_i32_0 : i32, i32, i32
  }
}

</mosaic_0001>

<bundles_post_ra>
// kernel: cnn2_forward.1
= control target key start
LH: loop header
LB: loop body
LE: loop exit
PB: predicated region body
PF: predicated region fallthrough
CT: control target
= control target key end

     0   :  { %vm158_vm0 = vcmask 1044480   ;;  %vm159_vm1 = vcmask 1045504   ;;  %v1913_v5 = vmov 65535   ;;  %vm282_vm2 = vcmask 1043456   ;;  %s3144_s0 = inlined_call_operand.vmem [shape: bf16[2,75,196], index: 0, kind: input, shape index: {}]   ;;  %s3145_s1 = inlined_call_operand.vmem [shape: bf16[4,1,75], index: 1, kind: input, shape index: {}]   ;;  %s3146_s2 = inlined_call_operand.vmem [shape: f32[196,49], index: 2, kind: input, shape index: {}]   ;;  %s3147_s3 = inlined_call_operand.vmem [shape: f32[4,49,300], index: 3, kind: input, shape index: {}]   ;;  %s3148_s4 = inlined_call_operand.vmem [shape: f32[300,10], index: 4, kind: input, shape index: {}]   ;;  %s3149_s5 = inlined_call_operand.hbm [shape: f32[2,1,10], index: 5, kind: output, shape index: {}]  }
   0x1   :  { %v1684_v0 = vld [vmem:[%s3144_s0 + $0x90] sm:$0xf]  ;;  %v1857_v1 = vld [vmem:[%s3144_s0 + $0x94] sm:$0x30]  ;;  %v1856_v3 = vld [vmem:[%s3144_s0 + $0x94] sm:$0xf] }
   0x2   :  { %v1685_v2 = vor.u32 %v1857_v1, %v1684_v0  ;;  %v1686_v4 = vld [vmem:[%s3144_s0 + $0x98] sm:$0x30]  ;;  %v160_v6 = vsel %vm158_vm0, 4294967295, %v1913_v5  ;;  %v1676_v8 = vld [vmem:[%s3144_s0 + $0x80] sm:$0xf]  ;;  %vm154_vm3 = vcmask 613376  }
   0x3   :  { %v1689_v7 = vor.u32 %v1856_v3, %v1686_v4  ;;  %v1855_v9 = vld [vmem:[%s3144_s0 + $0x84] sm:$0xf0]  ;;  %v161_v10 = vsel %vm159_vm1, %v160_v6, 0  ;;  %v1854_v11 = vld [vmem:[%s3144_s0 + $0x84] sm:$0xf]  ;;  %v2111_v62 = vld [vmem:[%s3146_s2 + $0x78] sm:$0xff] }
   0x4   :  { %v1678_v12 = vld [vmem:[%s3144_s0 + $0x88] sm:$0xf0]  ;;  %v1971_v13 = vand.u32 %v1685_v2, %v161_v10  ;;  %v1846_v15 = vld [vmem:[%s3144_s0 + $0x44] sm:$0xf]  ;;  %v1983_v17 = vor.u32 %v1855_v9, %v1676_v8  ;;  %v1668_v19 = vld [vmem:[%s3144_s0 + $0x70] sm:$0xf] }
   0x5   :  { %v1973_v14 = vand.u32 %v1689_v7, %v161_v10  ;;  %v1644_v16 = vld [vmem:[%s3144_s0 + $0x48] sm:$0x30]  ;;  %v1985_v18 = vor.u32 %v1854_v11, %v1678_v12  ;;  %v1853_v21 = vld [vmem:[%s3144_s0 + $0x74] sm:$0xf0]  ;;  %v1852_v22 = vld [vmem:[%s3144_s0 + $0x74] sm:$0xf] }
   0x6   :  { %251 = vmatpush.bf16.msra.mxu2 %v1971_v13  ;;  %v1647_v20 = vor.u32 %v1846_v15, %v1644_v16  ;;  %v1670_v23 = vld [vmem:[%s3144_s0 + $0x78] sm:$0xf0]  ;;  %v1844_v25 = vld [vmem:[%s3144_s0 + $0x34] sm:$0xf]  ;;  %v1642_v27 = vld [vmem:[%s3144_s0 + $0x40] sm:$0xf]  ;;  %v2015_v29 = vor.u32 %v1853_v21, %v1668_v19 }
   0x7   :  { %264 = vmatpush.bf16.msra.mxu3 %v1973_v14  ;;  %v1636_v26 = vld [vmem:[%s3144_s0 + $0x38] sm:$0xf0]  ;;  %v1847_v28 = vld [vmem:[%s3144_s0 + $0x44] sm:$0x30]  ;;  %v2017_v30 = vor.u32 %v1852_v22, %v1670_v23  ;;  %v1660_v31 = vld [vmem:[%s3144_s0 + $0x60] sm:$0xf] }
   0x8   :  { %v1999_v24 = vand.u32 %v1647_v20, %v161_v10  ;;  %v1851_v32 = vld [vmem:[%s3144_s0 + $0x64] sm:$0xf0]  ;;  %v1643_v33 = vor.u32 %v1847_v28, %v1642_v27  ;;  %v1850_v34 = vld [vmem:[%s3144_s0 + $0x64] sm:$0xf]  ;;  %v1662_v35 = vld [vmem:[%s3144_s0 + $0x68] sm:$0xf0]  ;;  %v2032_v36 = vor.u32 %v1844_v25, %v1636_v26 }
   0x9   :  { %v1842_v37 = vld [vmem:[%s3144_s0 + $0x24] sm:$0xf]  ;;  %v1628_v39 = vld [vmem:[%s3144_s0 + $0x28] sm:$0xf0]  ;;  %v1634_v40 = vld [vmem:[%s3144_s0 + $0x30] sm:$0xf]  ;;  %v2050_v42 = vor.u32 %v1851_v32, %v1660_v31  ;;  %v2052_v43 = vor.u32 %v1850_v34, %v1662_v35 }
   0xa   :  { %252 = vmatpush.bf16.msra.mxu2 %v1983_v17  ;;  %184 = vmatpush.bf16.msra.mxu1 %v1999_v24  ;;  %v2037_v38 = vand.u32 %v1643_v33, %v161_v10  ;;  %v1845_v41 = vld [vmem:[%s3144_s0 + $0x34] sm:$0xf0]  ;;  %v1652_v44 = vld [vmem:[%s3144_s0 + $0x50] sm:$0xf]  ;;  %v1848_v46 = vld [vmem:[%s3144_s0 + $0x54] sm:$0xf]  ;;  %v2068_v48 = vor.u32 %v1842_v37, %v1628_v39 }
   0xb   :  { %265 = vmatpush.bf16.msra.mxu3 %v1985_v18  ;;  %v1849_v45 = vld [vmem:[%s3144_s0 + $0x54] sm:$0xf0]  ;;  %v1654_v47 = vld [vmem:[%s3144_s0 + $0x58] sm:$0xf0]  ;;  %v2070_v49 = vor.u32 %v1845_v41, %v1634_v40  ;;  %v1840_v50 = vld [vmem:[%s3144_s0 + $0x14] sm:$0xf] }
   0xc   :  { %171 = vmatpush.bf16.msra.mxu0 %v2037_v38  ;;  %v1620_v51 = vld [vmem:[%s3144_s0 + $0x18] sm:$0xf0]  ;;  %v1626_v52 = vld [vmem:[%s3144_s0 + $0x20] sm:$0xf]  ;;  %v1843_v53 = vld [vmem:[%s3144_s0 + $0x24] sm:$0xf0]  ;;  %v2086_v54 = vor.u32 %v1849_v45, %v1652_v44  ;;  %v2088_v55 = vor.u32 %v1848_v46, %v1654_v47 }
   0xd   :  { %v2092_v56 = vor.u32 %v1840_v50, %v1620_v51  ;;  %v2094_v57 = vor.u32 %v1843_v53, %v1626_v52  ;;  %v1838_v58 = vld [vmem:[%s3144_s0 + $0x4] sm:$0xf]  ;;  %v1612_v59 = vld [vmem:[%s3144_s0 + $0x8] sm:$0xf0]  ;;  %v1618_v60 = vld [vmem:[%s3144_s0 + $0x10] sm:$0xf] }
   0xe   :  { %253 = vmatpush.bf16.msra.mxu2 %v2015_v29  ;;  %185 = vmatpush.bf16.msra.mxu1 %v2032_v36  ;;  %v1841_v61 = vld [vmem:[%s3144_s0 + $0x14] sm:$0xf0]  ;;  %v2116_v63 = vld [vmem:[%s3146_s2 + $0xc0] sm:$0xf] }
   0xf   :  { %266 = vmatpush.bf16.msra.mxu3 %v2017_v30  ;;  %v105_v0 = vld [vmem:[%s3145_s1] sm:$0x1] }
  0x10   :  { %172 = vmatpush.bf16.msra.mxu0 %v2070_v49 }
  0x12   :  { %254 = vmatpush.bf16.msra.mxu2 %v2050_v42  ;;  %186 = vmatpush.bf16.msra.mxu1 %v2068_v48 }
  0x13   :  { %267 = vmatpush.bf16.msra.mxu3 %v2052_v43 }
  0x16   :  { %255 = vmatpush.bf16.msra.mxu2 %v2086_v54 }
  0x17   :  { %268 = vmatpush.bf16.msra.mxu3 %v2088_v55 }
  0x18   :  { %10 = vsyncpa [#allocation3], 0  ;;  %187 = vmatpush.bf16.msra.mxu1 %v2092_v56  ;;  %173 = vmatpush.bf16.msra.mxu0 %v2094_v57  ;;  %v2125_v1 = vor.u32 %v1838_v58, %v1612_v59  ;;  %v2127_v2 = vor.u32 %v1841_v61, %v1618_v60  ;;  %v2132_v3 = vld [vmem:[%s3146_s2 + $0x70] sm:$0xff]  ;;  %v2137_v4 = vld [vmem:[%s3146_s2 + $0xb8] sm:$0xff]  ;;  %vm278_vm4 = vcmask 556032   ;;  %vm563_vm5 = vcmask 1040384  }
  0x19   :  { %v1610_v5 = vld [vmem:[%s3144_s0] sm:$0xf]  ;;  %v1839_v6 = vld [vmem:[%s3144_s0 + $0x4] sm:$0xf0]  ;;  %1690 = vmatmul.msk.bf16.vlgmr.msra.gmra.mxu2 %vm154_vm3, %v105_v0  ;;  %v2160_v8 = vld [vmem:[%s3146_s2 + $0xb0] sm:$0xff]  ;;  %vm559_vm6 = vcmask 400384  }
  0x1a   :  { %329 = vmatpush.msrb.mxu2 %v2111_v62  ;;  %1691 = vmatmul.msk.bf16.vlgmr.msra.gmra.mxu3 %vm154_vm3, %v105_v0  ;;  %v2153_v7 = vld [vmem:[%s3146_s2 + $0x68] sm:$0xff]  ;;  %v2164_v9 = vor.u32 %v1839_v6, %v1610_v5  ;;  %v2169_v10 = vld [vmem:[%s3146_s2 + $0x60] sm:$0xff]  ;;  %v2177_v11 = vld [vmem:[%s3146_s2 + $0x58] sm:$0xff]  ;;  %vm1457_vm7 = vcmask 359424   ;;  %vm1587_vm8 = vcmask 73728   ;;  %s1596_s26 = sshll.u32 %s3149_s5, 4  ;;  %s1597_s26 = int_to_ptr.hbm [resolvable:$true] %s1596_s26 }
  0x1b   :  { %1694 = vmatpush.msk.msrb.mxu3 %vm282_vm2, %v2116_v63  ;;  %v2185_v12 = vld [vmem:[%s3146_s2 + $0xa8] sm:$0xff]  ;;  %v2191_v15 = vld [vmem:[%s3146_s2 + $0x50] sm:$0xff]  ;;  %v2199_v16 = vld [vmem:[%s3146_s2 + $0xa0] sm:$0xff]  ;;  %s1915_s27 = smov 16   ;;  %s1916_s28 = smov 1  }
  0x1c   :  { %330 = vmatpush.msrb.mxu2 %v2132_v3  ;;  %188 = vmatpush.bf16.msra.mxu1 %v2125_v1  ;;  %v2204_v19 = vld [vmem:[%s3146_s2 + $0x48] sm:$0xff]  ;;  %v2213_v20 = vld [vmem:[%s3146_s2 + $0x98] sm:$0xff]  ;;  %v2219_v21 = vld [vmem:[%s3146_s2 + $0x40] sm:$0xff] }
  0x1d   :  { %357 = vmatpush.msrb.mxu3 %v2137_v4  ;;  %174 = vmatpush.bf16.msra.mxu0 %v2127_v2  ;;  %v2227_v22 = vld [vmem:[%s3146_s2 + $0x90] sm:$0xff]  ;;  %v2233_v23 = vld [vmem:[%s3146_s2 + $0x38] sm:$0xff]  ;;  %v2241_v25 = vld [vmem:[%s3146_s2 + $0x88] sm:$0xff] }
  0x1e   :  { %331 = vmatpush.msrb.mxu2 %v2153_v7  ;;  %3166 = vst [vmem:[#allocation5_spill] sm:$0xff] %v2241_v25  ;;  %v2247_v26 = vld [vmem:[%s3146_s2 + $0x30] sm:$0xff]  ;;  %v2255_v27 = vld [vmem:[%s3146_s2 + $0x80] sm:$0xff]  ;;  %v2261_v28 = vld [vmem:[%s3146_s2 + $0x28] sm:$0xff] }
  0x1f   :  { %358 = vmatpush.msrb.mxu3 %v2160_v8  ;;  %1649 = vmatmul.msk.bf16.vlgmr.msra.gmra.mxu1 %vm154_vm3, %v105_v0  ;;  %3167 = vst [vmem:[#allocation6_spill] sm:$0xff] %v2255_v27  ;;  %v2270_v31 = vld [vmem:[%s3146_s2 + $0x20] sm:$0xff]  ;;  %v2279_v32 = vld [vmem:[%s3146_s2 + $0x18] sm:$0xff]  ;;  %v2287_v33 = vld [vmem:[%s3146_s2 + $0x10] sm:$0xff] }
  0x20   :  { %1692 = vmatpush.msk.msrb.mxu1 %vm282_vm2, %v2116_v63  ;;  %332 = vmatpush.msrb.mxu2 %v2169_v10  ;;  %3168 = vst [vmem:[#allocation7_spill] sm:$0xff] %v2261_v28  ;;  %v2296_v34 = vld [vmem:[%s3146_s2 + $0x8] sm:$0xff]  ;;  %v2304_v35 = vld [vmem:[%s3146_s2] sm:$0xff]  ;;  %v2395_v59 = vld [vmem:[%s3147_s3 + $0x138] sm:$0x1] }
  0x21   :  { %175 = vmatpush.bf16.msra.mxu0 %v2164_v9  ;;  %359 = vmatpush.msrb.mxu3 %v2185_v12  ;;  %3169 = vst [vmem:[#allocation8_spill] sm:$0xff] %v2270_v31  ;;  %v1696_v52 = vld [vmem:[%s3145_s1 + $0x1] sm:$0x1]  ;;  %v1724_v60 = vld [vmem:[%s3147_s3 + $0x140] sm:$0x1]  ;;  %v2418_v6 = vld [vmem:[%s3147_s3 + $0x108] sm:$0xff] }
  0x22   :  { %314 = vmatpush.msrb.mxu1 %v2137_v4  ;;  %333 = vmatpush.msrb.mxu2 %v2177_v11  ;;  %3170 = vst [vmem:[#allocation9_spill] sm:$0xff] %v2279_v32  ;;  %v2403_v61 = vld [vmem:[%s3147_s3 + $0x120] sm:$0xff]  ;;  %v1725_v5 = vld [vmem:[%s3147_s3 + $0x148] sm:$0x1] }
  0x23   :  { %360 = vmatpush.msrb.mxu3 %v2199_v16  ;;  %3171 = vst [vmem:[#allocation10_spill] sm:$0xff] %v2287_v33 }
  0x24   :  { %315 = vmatpush.msrb.mxu1 %v2160_v8  ;;  %1648 = vmatmul.msk.bf16.vlgmr.msra.gmra.mxu0 %vm154_vm3, %v105_v0  ;;  %3172 = vst [vmem:[#allocation11_spill] sm:$0xff] %v2296_v34  ;;  %v1721_v0 = vld [vmem:[%s3147_s3 + $0x128] sm:$0xff] }
  0x25   :  { %286 = vmatpush.msrb.mxu0 %v2111_v62  ;;  %334 = vmatpush.msrb.mxu2 %v2191_v15  ;;  %3173 = vst [vmem:[#allocation12_spill] sm:$0xff] %v2304_v35 }
  0x26   :  { %316 = vmatpush.msrb.mxu1 %v2185_v12  ;;  %361 = vmatpush.msrb.mxu3 %v2213_v20 }
  0x27   :  { %287 = vmatpush.msrb.mxu0 %v2132_v3  ;;  %335 = vmatpush.msrb.mxu2 %v2204_v19 }
  0x28   :  { %317 = vmatpush.msrb.mxu1 %v2199_v16  ;;  %362 = vmatpush.msrb.mxu3 %v2227_v22 }
  0x29   :  { %288 = vmatpush.msrb.mxu0 %v2153_v7  ;;  %336 = vmatpush.msrb.mxu2 %v2219_v21 }
  0x2a   :  { %318 = vmatpush.msrb.mxu1 %v2213_v20  ;;  %363 = vmatpush.msrb.mxu3 %v2241_v25 }
  0x2b   :  { %289 = vmatpush.msrb.mxu0 %v2169_v10  ;;  %337 = vmatpush.msrb.mxu2 %v2233_v23 }
  0x2c   :  { %319 = vmatpush.msrb.mxu1 %v2227_v22  ;;  %364 = vmatpush.msrb.mxu3 %v2255_v27 }
  0x2d   :  { %290 = vmatpush.msrb.mxu0 %v2177_v11  ;;  %338 = vmatpush.msrb.mxu2 %v2247_v26 }
  0x2e   :  { %411 = vmatpush.bf16.msra.mxu3 %v1999_v24  ;;  %320 = vmatpush.msrb.mxu1 %v2241_v25 }
  0x2f   :  { %291 = vmatpush.msrb.mxu0 %v2191_v15  ;;  %339 = vmatpush.msrb.mxu2 %v2261_v28 }
  0x30   :  { %321 = vmatpush.msrb.mxu1 %v2255_v27 }
  0x31   :  { %292 = vmatpush.msrb.mxu0 %v2204_v19  ;;  %340 = vmatpush.msrb.mxu2 %v2270_v31 }
  0x32   :  { %398 = vmatpush.bf16.msra.mxu1 %v2037_v38  ;;  %412 = vmatpush.bf16.msra.mxu3 %v2032_v36 }
  0x33   :  { %293 = vmatpush.msrb.mxu0 %v2219_v21  ;;  %341 = vmatpush.msrb.mxu2 %v2279_v32 }
  0x35   :  { %294 = vmatpush.msrb.mxu0 %v2233_v23  ;;  %342 = vmatpush.msrb.mxu2 %v2287_v33 }
  0x36   :  { %399 = vmatpush.bf16.msra.mxu1 %v2070_v49  ;;  %413 = vmatpush.bf16.msra.mxu3 %v2068_v48 }
  0x37   :  { %295 = vmatpush.msrb.mxu0 %v2247_v26  ;;  %343 = vmatpush.msrb.mxu2 %v2296_v34 }
  0x39   :  { %296 = vmatpush.msrb.mxu0 %v2261_v28  ;;  %344 = vmatpush.msrb.mxu2 %v2304_v35 }
  0x3a   :  { %400 = vmatpush.bf16.msra.mxu1 %v2094_v57  ;;  %414 = vmatpush.bf16.msra.mxu3 %v2092_v56 }
  0x3b   :  { %437 = vmatpush.bf16.msra.mxu2 %v1973_v14  ;;  %297 = vmatpush.msrb.mxu0 %v2270_v31 }
  0x3d   :  { %298 = vmatpush.msrb.mxu0 %v2279_v32 }
  0x3e   :  { %401 = vmatpush.bf16.msra.mxu1 %v2127_v2  ;;  %415 = vmatpush.bf16.msra.mxu3 %v2125_v1 }
  0x3f   :  { %438 = vmatpush.bf16.msra.mxu2 %v1985_v18  ;;  %299 = vmatpush.msrb.mxu0 %v2287_v33 }
  0x41   :  { %300 = vmatpush.msrb.mxu0 %v2296_v34 }
  0x42   :  { %402 = vmatpush.bf16.msra.mxu1 %v2164_v9 }
  0x43   :  { %439 = vmatpush.bf16.msra.mxu2 %v2017_v30  ;;  %301 = vmatpush.msrb.mxu0 %v2304_v35 }
  0x45   :  { %424 = vmatpush.bf16.msra.mxu0 %v1971_v13 }
  0x47   :  { %440 = vmatpush.bf16.msra.mxu2 %v2052_v43 }
  0x49   :  { %425 = vmatpush.bf16.msra.mxu0 %v1983_v17 }
  0x4b   :  { %441 = vmatpush.bf16.msra.mxu2 %v2088_v55 }
  0x4d   :  { %426 = vmatpush.bf16.msra.mxu0 %v2015_v29 }
  0x51   :  { %427 = vmatpush.bf16.msra.mxu0 %v2050_v42 }
  0x55   :  { %428 = vmatpush.bf16.msra.mxu0 %v2086_v54 }
  0x9c   :  { %v190_v37 = vpop.f32.mrf.mxu1  ;;  %v257_v39 = vpop.f32.mrf.mxu2 }
  0x9d   :  { %v270_v40 = vpop.f32.mrf.mxu3  ;;  %v275_v41 = vmax.f32 %v190_v37, 0.0  ;;  %v276_v44 = vmax.f32 %v257_v39, 0.0  ;;  %v1718_v37 = vld [vmem:[%s3147_s3 + $0x110] sm:$0xff] }
  0x9e   :  { %v277_v45 = vmax.f32 %v270_v40, 0.0  ;;  %v1722_v39 = vld [vmem:[%s3147_s3 + $0x130] sm:$0xff]  ;;  %v1719_v40 = vld [vmem:[%s3147_s3 + $0x118] sm:$0xff] }
  0x9f   :  { %1693 = vmatmul.msk.f32.vlgmr.msrb.gmra.mxu1 %vm278_vm4, %v275_v41  ;;  %345 = vmatmul.f32.vlgmr.msrb.gmra.mxu2 %v276_v44  ;;  %v2434_v41 = vld [vmem:[%s3147_s3 + $0xf0] sm:$0xff]  ;;  %v1715_v44 = vld [vmem:[%s3147_s3 + $0xf8] sm:$0xff] }
  0xa0   :  { %1695 = vmatmul.msk.f32.vlgmr.msrb.gmra.mxu3 %vm278_vm4, %v277_v45  ;;  %454 = vmatpush.msrb.mxu1 %v2111_v62  ;;  %v1716_v45 = vld [vmem:[%s3147_s3 + $0x100] sm:$0xff] }
  0xa1   :  { %v177_v46 = vpop.f32.mrf.mxu0  ;;  %1701 = vmatpush.msk.msrb.mxu3 %vm282_vm2, %v2116_v63  ;;  %1703 = vmatpush.msk.msrb.mxu2 %vm282_vm2, %v2116_v63 }
  0xa2   :  { %v274_v47 = vmax.f32 %v177_v46, 0.0  ;;  %455 = vmatpush.msrb.mxu1 %v2132_v3  ;;  %v2446_v46 = vld [vmem:[%s3147_s3 + $0xd8] sm:$0xff] }
  0xa3   :  { %482 = vmatpush.msrb.mxu3 %v2137_v4  ;;  %525 = vmatpush.msrb.mxu2 %v2137_v4 }
  0xa4   :  { %302 = vmatmul.f32.vlgmr.msrb.gmra.mxu0 %v274_v47  ;;  %v192_v50 = vpop.f32.mrf.mxu1  ;;  %v259_v53 = vpop.f32.mrf.mxu2  ;;  %456 = vmatpush.msrb.mxu1 %v2153_v7  ;;  %v1712_v47 = vld [vmem:[%s3147_s3 + $0xe0] sm:$0xff] }
  0xa5   :  { %497 = vmatpush.msrb.mxu0 %v2111_v62  ;;  %v272_v51 = vpop.f32.mrf.mxu3  ;;  %483 = vmatpush.msrb.mxu3 %v2160_v8  ;;  %v1713_v50 = vld [vmem:[%s3147_s3 + $0xe8] sm:$0xff] }
  0xa6   :  { %526 = vmatpush.msrb.mxu2 %v2160_v8  ;;  %457 = vmatpush.msrb.mxu1 %v2169_v10  ;;  %v1708_v51 = vld [vmem:[%s3147_s3 + $0xc0] sm:$0xff] }
  0xa7   :  { %498 = vmatpush.msrb.mxu0 %v2132_v3  ;;  %1697 = vmatmul.msk.bf16.vlgmr.msra.gmra.mxu1 %vm154_vm3, %v1696_v52 }
  0xa8   :  { %1698 = vmatmul.msk.bf16.vlgmr.msra.gmra.mxu3 %vm154_vm3, %v1696_v52  ;;  %1700 = vmatmul.msk.bf16.vlgmr.msra.gmra.mxu2 %vm154_vm3, %v1696_v52 }
  0xa9   :  { %v179_v58 = vpop.f32.mrf.mxu0  ;;  %499 = vmatpush.msrb.mxu0 %v2153_v7  ;;  %484 = vmatpush.msrb.mxu3 %v2185_v12 }
  0xaa   :  { %527 = vmatpush.msrb.mxu2 %v2185_v12  ;;  %458 = vmatpush.msrb.mxu1 %v2177_v11  ;;  %v1710_v58 = vld [vmem:[%s3147_s3 + $0xd0] sm:$0xff] }
  0xab   :  { %500 = vmatpush.msrb.mxu0 %v2169_v10  ;;  %485 = vmatpush.msrb.mxu3 %v2199_v16 }
  0xac   :  { %1699 = vmatmul.msk.bf16.vlgmr.msra.gmra.mxu0 %vm154_vm3, %v1696_v52  ;;  %459 = vmatpush.msrb.mxu1 %v2191_v15  ;;  %v1709_v52 = vld [vmem:[%s3147_s3 + $0xc8] sm:$0xff] }
  0xad   :  { %528 = vmatpush.msrb.mxu2 %v2199_v16  ;;  %501 = vmatpush.msrb.mxu0 %v2177_v11 }
  0xae   :  { %486 = vmatpush.msrb.mxu3 %v2213_v20  ;;  %460 = vmatpush.msrb.mxu1 %v2204_v19 }
  0xaf   :  { %529 = vmatpush.msrb.mxu2 %v2213_v20  ;;  %502 = vmatpush.msrb.mxu0 %v2191_v15 }
  0xb0   :  { %487 = vmatpush.msrb.mxu3 %v2227_v22  ;;  %461 = vmatpush.msrb.mxu1 %v2219_v21 }
  0xb1   :  { %530 = vmatpush.msrb.mxu2 %v2227_v22  ;;  %503 = vmatpush.msrb.mxu0 %v2204_v19 }
  0xb2   :  { %488 = vmatpush.msrb.mxu3 %v2241_v25  ;;  %462 = vmatpush.msrb.mxu1 %v2233_v23 }
  0xb3   :  { %531 = vmatpush.msrb.mxu2 %v2241_v25  ;;  %504 = vmatpush.msrb.mxu0 %v2219_v21 }
  0xb4   :  { %489 = vmatpush.msrb.mxu3 %v2255_v27  ;;  %463 = vmatpush.msrb.mxu1 %v2247_v26 }
  0xb5   :  { %532 = vmatpush.msrb.mxu2 %v2255_v27  ;;  %505 = vmatpush.msrb.mxu0 %v2233_v23 }
  0xb6   :  { %464 = vmatpush.msrb.mxu1 %v2261_v28  ;;  %1726 = vmatpush.msk.msra.mxu3 %vm563_vm5, %v2395_v59 }
  0xb7   :  { %506 = vmatpush.msrb.mxu0 %v2247_v26  ;;  %1730 = vmatpush.msk.msra.mxu2 %vm563_vm5, %v1725_v5 }
  0xb8   :  { %465 = vmatpush.msrb.mxu1 %v2270_v31  ;;  %583 = vmatpush.msra.mxu3 %v2403_v61 }
  0xb9   :  { %507 = vmatpush.msrb.mxu0 %v2261_v28  ;;  %623 = vmatpush.msra.mxu2 %v1722_v39 }
  0xba   :  { %466 = vmatpush.msrb.mxu1 %v2279_v32  ;;  %584 = vmatpush.msra.mxu3 %v2418_v6 }
  0xbb   :  { %508 = vmatpush.msrb.mxu0 %v2270_v31  ;;  %624 = vmatpush.msra.mxu2 %v1719_v40 }
  0xbc   :  { %467 = vmatpush.msrb.mxu1 %v2287_v33  ;;  %585 = vmatpush.msra.mxu3 %v2434_v41 }
  0xbd   :  { %509 = vmatpush.msrb.mxu0 %v2279_v32  ;;  %625 = vmatpush.msra.mxu2 %v1716_v45 }
  0xbe   :  { %468 = vmatpush.msrb.mxu1 %v2296_v34  ;;  %586 = vmatpush.msra.mxu3 %v2446_v46 }
  0xbf   :  { %510 = vmatpush.msrb.mxu0 %v2287_v33  ;;  %626 = vmatpush.msra.mxu2 %v1713_v50 }
  0xc0   :  { %469 = vmatpush.msrb.mxu1 %v2304_v35  ;;  %587 = vmatpush.msra.mxu3 %v1708_v51 }
  0xc1   :  { %511 = vmatpush.msrb.mxu0 %v2296_v34  ;;  %627 = vmatpush.msra.mxu2 %v1710_v58 }
  0xc2   :  { %1728 = vmatpush.msk.msra.mxu1 %vm563_vm5, %v1724_v60 }
  0xc3   :  { %512 = vmatpush.msrb.mxu0 %v2304_v35 }
  0xc4   :  { %603 = vmatpush.msra.mxu1 %v1721_v0 }
  0xc5   :  { %1734 = vmatpush.msk.msra.mxu0 %vm563_vm5, %v1724_v60  ;;  %v1705_v60 = vld [vmem:[%s3147_s3 + $0xa8] sm:$0xff] }
  0xc6   :  { %604 = vmatpush.msra.mxu1 %v1718_v37  ;;  %588 = vmatpush.msra.mxu3 %v1705_v60 }
  0xc7   :  { %666 = vmatpush.msra.mxu0 %v1721_v0  ;;  %v1706_v0 = vld [vmem:[%s3147_s3 + $0xb0] sm:$0xff] }
  0xc8   :  { %605 = vmatpush.msra.mxu1 %v1715_v44 }
  0xc9   :  { %667 = vmatpush.msra.mxu0 %v1718_v37  ;;  %v1707_v37 = vld [vmem:[%s3147_s3 + $0xb8] sm:$0xff] }
  0xca   :  { %606 = vmatpush.msra.mxu1 %v1712_v47  ;;  %628 = vmatpush.msra.mxu2 %v1707_v37 }
  0xcb   :  { %668 = vmatpush.msra.mxu0 %v1715_v44 }
  0xcc   :  { %607 = vmatpush.msra.mxu1 %v1709_v52 }
  0xcd   :  { %669 = vmatpush.msra.mxu0 %v1712_v47 }
  0xce   :  { %608 = vmatpush.msra.mxu1 %v1706_v0 }
  0xcf   :  { %670 = vmatpush.msra.mxu0 %v1709_v52  ;;  %v2482_v52 = vld [vmem:[%s3147_s3 + $0xa0] sm:$0x1] }
  0xd1   :  { %671 = vmatpush.msra.mxu0 %v1706_v0 }
 0x11c   :  { %v323_v53 = vpop.f32.mrf.mxu1 }
 0x121   :  { %v303_v44 = vpop.f32.mrf.mxu0 }
 0x122   :  { %v2474_v35 = vadd.f32 %v323_v53, %v303_v44  ;;  %v346_v34 = vpop.f32.mrf.mxu2 }
 0x123   :  { %v366_v33 = vpop.f32.mrf.mxu3 }
 0x124   :  { %v2476_v32 = vadd.f32 %v366_v33, %v346_v34  ;;  %v404_v47 = vpop.f32.mrf.mxu1  ;;  %v381_v34 = vld [vmem:[%s3147_s3 + $0x60] sm:$0xff] }
 0x125   :  { %v447_v31 = vmax.f32 %v404_v47, 0.0 }
 0x127   :  { %470 = vmatmul.f32.vlgmr.msrb.gmra.mxu1 %v447_v31  ;;  %v387_v31 = vld [vmem:[%s3147_s3 + $0x90] sm:$0x1] }
 0x128   :  { %1736 = vmatpush.msk.msrb.mxu1 %vm563_vm5, %v1725_v5 }
 0x129   :  { %v430_v27 = vpop.f32.mrf.mxu0 }
 0x12a   :  { %v449_v28 = vmax.f32 %v430_v27, 0.0  ;;  %686 = vmatpush.msrb.mxu1 %v1722_v39  ;;  %v384_v27 = vld [vmem:[%s3147_s3 + $0x78] sm:$0xff] }
 0x12b   :  { %v417_v53 = vpop.f32.mrf.mxu3  ;;  %v443_v44 = vpop.f32.mrf.mxu2 }
 0x12c   :  { %513 = vmatmul.f32.vlgmr.msrb.gmra.mxu0 %v449_v28  ;;  %v448_v0 = vmax.f32 %v417_v53, 0.0  ;;  %v450_v25 = vmax.f32 %v443_v44, 0.0  ;;  %v406_v33 = vpop.f32.mrf.mxu1  ;;  %687 = vmatpush.msrb.mxu1 %v1719_v40  ;;  %v372_v40 = vld [vmem:[%s3147_s3 + $0x18] sm:$0xff] }
 0x12d   :  { %1742 = vmatpush.msk.msrb.mxu0 %vm563_vm5, %v2482_v52  ;;  %v385_v33 = vld [vmem:[%s3147_s3 + $0x80] sm:$0xff] }
 0x12e   :  { %1702 = vmatmul.msk.f32.vlgmr.msrb.gmra.mxu3 %vm278_vm4, %v448_v0  ;;  %1704 = vmatmul.msk.f32.vlgmr.msrb.gmra.mxu2 %vm278_vm4, %v450_v25  ;;  %v378_v25 = vld [vmem:[%s3147_s3 + $0x48] sm:$0xff]  ;;  %v388_v0 = vld [vmem:[%s3147_s3 + $0x98] sm:$0x1] }
 0x12f   :  { %1732 = vmatpush.msk.msrb.mxu3 %vm563_vm5, %v2395_v59  ;;  %1738 = vmatpush.msk.msrb.mxu2 %vm563_vm5, %v387_v31  ;;  %v2510_v59 = vld [vmem:[%s3147_s3 + $0x88] sm:$0xff] }
 0x130   :  { %688 = vmatpush.msrb.mxu1 %v1716_v45  ;;  %758 = vmatpush.msrb.mxu0 %v2510_v59  ;;  %v369_v45 = vld [vmem:[%s3147_s3] sm:$0xff] }
 0x131   :  { %v432_v28 = vpop.f32.mrf.mxu0  ;;  %646 = vmatpush.msrb.mxu3 %v2403_v61  ;;  %718 = vmatpush.msrb.mxu2 %v384_v27  ;;  %v375_v61 = vld [vmem:[%s3147_s3 + $0x30] sm:$0xff] }
 0x132   :  { %689 = vmatpush.msrb.mxu1 %v1713_v50  ;;  %v2540_v50 = vld [vmem:[%s3147_s3 + $0x28] sm:$0xff] }
 0x133   :  { %v419_v5 = vpop.f32.mrf.mxu3  ;;  %v445_v39 = vpop.f32.mrf.mxu2  ;;  %647 = vmatpush.msrb.mxu3 %v2418_v6  ;;  %719 = vmatpush.msrb.mxu2 %v381_v34  ;;  %v2519_v6 = vld [vmem:[%s3147_s3 + $0x70] sm:$0xff]  ;;  %v382_v28 = vld [vmem:[%s3147_s3 + $0x68] sm:$0xff] }
 0x134   :  { %690 = vmatpush.msrb.mxu1 %v1710_v58  ;;  %759 = vmatpush.msrb.mxu0 %v2519_v6  ;;  %v379_v5 = vld [vmem:[%s3147_s3 + $0x50] sm:$0xff] }
 0x135   :  { %648 = vmatpush.msrb.mxu3 %v2434_v41  ;;  %720 = vmatpush.msrb.mxu2 %v378_v25  ;;  %v2528_v41 = vld [vmem:[%s3147_s3 + $0x58] sm:$0xff] }
 0x136   :  { %691 = vmatpush.msrb.mxu1 %v1707_v37  ;;  %760 = vmatpush.msrb.mxu0 %v2528_v41 }
 0x137   :  { %649 = vmatpush.msrb.mxu3 %v2446_v46  ;;  %721 = vmatpush.msrb.mxu2 %v375_v61  ;;  %v377_v46 = vld [vmem:[%s3147_s3 + $0x40] sm:$0xff] }
 0x138   :  { %761 = vmatpush.msrb.mxu0 %v377_v46 }
 0x139   :  { %650 = vmatpush.msrb.mxu3 %v1708_v51  ;;  %722 = vmatpush.msrb.mxu2 %v372_v40  ;;  %v2546_v51 = vld [vmem:[%s3147_s3 + $0x10] sm:$0xff] }
 0x13a   :  { %762 = vmatpush.msrb.mxu0 %v2540_v50 }
 0x13b   :  { %651 = vmatpush.msrb.mxu3 %v1705_v60  ;;  %723 = vmatpush.msrb.mxu2 %v369_v45 }
 0x13c   :  { %763 = vmatpush.msrb.mxu0 %v2546_v51 }
 0x1a4   :  { %v471_v58 = vpop.f32.mrf.mxu1 }
 0x1a9   :  { %v514_v60 = vpop.f32.mrf.mxu0 }
 0x1b1   :  { %v491_v37 = vpop.f32.mrf.mxu3  ;;  %v534_v47 = vpop.f32.mrf.mxu2 }
 0x1b2   :  { %v492_v53 = vadd.f32 %v491_v37, %v471_v58  ;;  %v535_v44 = vadd.f32 %v534_v47, %v514_v60  ;;  %v1774_v60 = vld [vmem:[%s3147_s3 + $0x1c8] sm:$0xff]  ;;  %v1775_v37 = vld [vmem:[%s3147_s3 + $0x1d0] sm:$0xff]  ;;  %v1776_v47 = vld [vmem:[%s3147_s3 + $0x1d8] sm:$0xff] }
 0x1b4   :  { %1727 = vmatmul.msk.f32.vlgmr.msra.gmra.mxu3 %vm559_vm6, %v492_v53  ;;  %1729 = vmatmul.msk.f32.vlgmr.msra.gmra.mxu1 %vm559_vm6, %v492_v53 }
 0x1b5   :  { %1731 = vmatmul.msk.f32.vlgmr.msra.gmra.mxu2 %vm559_vm6, %v492_v53  ;;  %1735 = vmatmul.msk.f32.vlgmr.msra.gmra.mxu0 %vm559_vm6, %v535_v44  ;;  %v1771_v53 = vld [vmem:[%s3147_s3 + $0x1b0] sm:$0xff] }
 0x1b6   :  { %1740 = vmatpush.msk.msra.mxu3 %vm563_vm5, %v388_v0  ;;  %1744 = vmatpush.msk.msra.mxu1 %vm563_vm5, %v387_v31  ;;  %v376_v31 = vld [vmem:[%s3147_s3 + $0x38] sm:$0xff] }
 0x1b7   :  { %1746 = vmatpush.msk.msra.mxu2 %vm563_vm5, %v388_v0  ;;  %839 = vmatpush.bf16.msra.mxu0 %v2037_v38  ;;  %v1773_v0 = vld [vmem:[%s3147_s3 + $0x1c0] sm:$0xff] }
 0x1b8   :  { %738 = vmatpush.msra.mxu3 %v385_v33  ;;  %781 = vmatpush.msra.mxu1 %v384_v27  ;;  %v373_v27 = vld [vmem:[%s3147_s3 + $0x20] sm:$0xff] }
 0x1b9   :  { %801 = vmatpush.msra.mxu2 %v385_v33 }
 0x1ba   :  { %739 = vmatpush.msra.mxu3 %v382_v28  ;;  %782 = vmatpush.msra.mxu1 %v381_v34  ;;  %v370_v34 = vld [vmem:[%s3147_s3 + $0x8] sm:$0xff] }
 0x1bb   :  { %802 = vmatpush.msra.mxu2 %v382_v28  ;;  %840 = vmatpush.bf16.msra.mxu0 %v2070_v49  ;;  %v1768_v28 = vld [vmem:[%s3147_s3 + $0x198] sm:$0xff] }
 0x1bc   :  { %740 = vmatpush.msra.mxu3 %v379_v5  ;;  %783 = vmatpush.msra.mxu1 %v378_v25 }
 0x1bd   :  { %1733 = vmatmul.msk.f32.vlgmr.msrb.gmra.mxu3 %vm559_vm6, %v535_v44  ;;  %1737 = vmatmul.msk.f32.vlgmr.msrb.gmra.mxu1 %vm559_vm6, %v535_v44  ;;  %v1772_v44 = vld [vmem:[%s3147_s3 + $0x1b8] sm:$0xff] }
 0x1be   :  { %1739 = vmatmul.msk.f32.vlgmr.msrb.gmra.mxu2 %vm559_vm6, %v2474_v35  ;;  %741 = vmatpush.msra.mxu3 %v376_v31 }
 0x1bf   :  { %1743 = vmatmul.msk.f32.vlgmr.msrb.gmra.mxu0 %vm559_vm6, %v2474_v35  ;;  %784 = vmatpush.msra.mxu1 %v375_v61 }
 0x1c0   :  { %803 = vmatpush.msra.mxu2 %v379_v5  ;;  %742 = vmatpush.msra.mxu3 %v373_v27 }
 0x1c1   :  { %785 = vmatpush.msra.mxu1 %v372_v40  ;;  %841 = vmatpush.bf16.msra.mxu0 %v2094_v57 }
 0x1c2   :  { %804 = vmatpush.msra.mxu2 %v376_v31  ;;  %743 = vmatpush.msra.mxu3 %v370_v34 }
 0x1c3   :  { %786 = vmatpush.msra.mxu1 %v369_v45 }
 0x1c4   :  { %1748 = vmatpush.msk.msrb.mxu3 %vm563_vm5, %v2482_v52  ;;  %805 = vmatpush.msra.mxu2 %v373_v27  ;;  %v1769_v27 = vld [vmem:[%s3147_s3 + $0x1a0] sm:$0xff] }
 0x1c5   :  { %852 = vmatpush.bf16.msrb.mxu1 %v1999_v24  ;;  %1741 = vmatmul.msk.f32.vlgmr.msra.gmra.mxu3 %vm559_vm6, %v2474_v35  ;;  %v1750_v35 = vld [vmem:[%s3145_s1 + $0x2] sm:$0x1] }
 0x1c6   :  { %821 = vmatpush.msrb.mxu3 %v2510_v59  ;;  %1745 = vmatmul.msk.f32.vlgmr.msra.gmra.mxu1 %vm559_vm6, %v2476_v32 }
 0x1c7   :  { %806 = vmatpush.msra.mxu2 %v370_v34  ;;  %842 = vmatpush.bf16.msra.mxu0 %v2127_v2 }
 0x1c8   :  { %1747 = vmatmul.msk.f32.vlgmr.msra.gmra.mxu2 %vm559_vm6, %v2476_v32  ;;  %822 = vmatpush.msrb.mxu3 %v2519_v6 }
 0x1c9   :  { %853 = vmatpush.bf16.msrb.mxu1 %v2032_v36  ;;  %865 = vmatpush.bf16.msrb.mxu2 %v1971_v13 }
 0x1ca   :  { %823 = vmatpush.msrb.mxu3 %v2528_v41 }
 0x1cb   :  { %843 = vmatpush.bf16.msra.mxu0 %v2164_v9 }
 0x1cc   :  { %824 = vmatpush.msrb.mxu3 %v377_v46  ;;  %v2690_v46 = vld [vmem:[%s3147_s3 + $0x1e0] sm:$0x1] }
 0x1cd   :  { %854 = vmatpush.bf16.msrb.mxu1 %v2068_v48  ;;  %866 = vmatpush.bf16.msrb.mxu2 %v1983_v17 }
 0x1ce   :  { %825 = vmatpush.msrb.mxu3 %v2540_v50  ;;  %1751 = vmatmul.msk.bf16.vlgmr.msra.gmra.mxu0 %vm154_vm3, %v1750_v35  ;;  %v1778_v50 = vld [vmem:[%s3147_s3 + $0x1e8] sm:$0x1] }
 0x1cf   :  { %895 = vmatpush.msrb.mxu0 %v2111_v62 }
 0x1d0   :  { %826 = vmatpush.msrb.mxu3 %v2546_v51  ;;  %v2698_v51 = vld [vmem:[%s3147_s3 + $0x1f0] sm:$0x1] }
 0x1d1   :  { %855 = vmatpush.bf16.msrb.mxu1 %v2092_v56  ;;  %1749 = vmatmul.msk.f32.vlgmr.msrb.gmra.mxu3 %vm559_vm6, %v2476_v32 }
 0x1d2   :  { %867 = vmatpush.bf16.msrb.mxu2 %v2015_v29  ;;  %878 = vmatpush.bf16.msra.mxu3 %v1973_v14 }
 0x1d3   :  { %896 = vmatpush.msrb.mxu0 %v2132_v3 }
 0x1d5   :  { %856 = vmatpush.bf16.msrb.mxu1 %v2125_v1  ;;  %897 = vmatpush.msrb.mxu0 %v2153_v7 }
 0x1d6   :  { %868 = vmatpush.bf16.msrb.mxu2 %v2050_v42  ;;  %879 = vmatpush.bf16.msra.mxu3 %v1985_v18 }
 0x1d7   :  { %898 = vmatpush.msrb.mxu0 %v2169_v10 }
 0x1d8   :  { %1752 = vmatmul.msk.bf16.vlgmr.msrb.gmra.mxu1 %vm154_vm3, %v1750_v35 }
 0x1d9   :  { %1755 = vmatpush.msk.msra.mxu1 %vm282_vm2, %v2116_v63  ;;  %899 = vmatpush.msrb.mxu0 %v2177_v11 }
 0x1da   :  { %869 = vmatpush.bf16.msrb.mxu2 %v2086_v54  ;;  %880 = vmatpush.bf16.msra.mxu3 %v2017_v30 }
 0x1db   :  { %923 = vmatpush.msra.mxu1 %v2137_v4  ;;  %900 = vmatpush.msrb.mxu0 %v2191_v15 }
 0x1dd   :  { %924 = vmatpush.msra.mxu1 %v2160_v8  ;;  %1753 = vmatmul.msk.bf16.vlgmr.msrb.gmra.mxu2 %vm154_vm3, %v1750_v35 }
 0x1de   :  { %938 = vmatpush.msra.mxu2 %v2111_v62  ;;  %881 = vmatpush.bf16.msra.mxu3 %v2052_v43  ;;  %v3174_v62 = vld [vmem:[#allocation5_spill] sm:$0xff] }
 0x1df   :  { %925 = vmatpush.msra.mxu1 %v2185_v12  ;;  %901 = vmatpush.msrb.mxu0 %v2204_v19 }
 0x1e0   :  { %939 = vmatpush.msra.mxu2 %v2132_v3  ;;  %v3175_v3 = vld [vmem:[#allocation7_spill] sm:$0xff] }
 0x1e1   :  { %926 = vmatpush.msra.mxu1 %v2199_v16  ;;  %902 = vmatpush.msrb.mxu0 %v2219_v21 }
 0x1e2   :  { %940 = vmatpush.msra.mxu2 %v2153_v7  ;;  %882 = vmatpush.bf16.msra.mxu3 %v2088_v55  ;;  %v3176_v7 = vld [vmem:[#allocation6_spill] sm:$0xff] }
 0x1e3   :  { %927 = vmatpush.msra.mxu1 %v2213_v20  ;;  %903 = vmatpush.msrb.mxu0 %v2233_v23 }
 0x1e4   :  { %941 = vmatpush.msra.mxu2 %v2169_v10  ;;  %v3177_v10 = vld [vmem:[#allocation8_spill] sm:$0xff] }
 0x1e5   :  { %928 = vmatpush.msra.mxu1 %v2227_v22  ;;  %1754 = vmatmul.msk.bf16.vlgmr.msra.gmra.mxu3 %vm154_vm3, %v1750_v35  ;;  %v1770_v35 = vld [vmem:[%s3147_s3 + $0x1a8] sm:$0xff] }
 0x1e6   :  { %1757 = vmatpush.msk.msrb.mxu3 %vm282_vm2, %v2116_v63  ;;  %904 = vmatpush.msrb.mxu0 %v2247_v26  ;;  %v3178_v63 = vld [vmem:[#allocation9_spill] sm:$0xff] }
 0x1e7   :  { %942 = vmatpush.msra.mxu2 %v2177_v11  ;;  %929 = vmatpush.msra.mxu1 %v3174_v62  ;;  %v3179_v11 = vld [vmem:[#allocation10_spill] sm:$0xff] }
 0x1e8   :  { %905 = vmatpush.msrb.mxu0 %v3175_v3  ;;  %966 = vmatpush.msrb.mxu3 %v2137_v4  ;;  %v3180_v4 = vld [vmem:[#allocation11_spill] sm:$0xff] }
 0x1e9   :  { %943 = vmatpush.msra.mxu2 %v2191_v15  ;;  %930 = vmatpush.msra.mxu1 %v3176_v7 }
 0x1ea   :  { %906 = vmatpush.msrb.mxu0 %v3177_v10  ;;  %967 = vmatpush.msrb.mxu3 %v2160_v8  ;;  %v3181_v8 = vld [vmem:[#allocation12_spill] sm:$0xff] }
 0x1eb   :  { %944 = vmatpush.msra.mxu2 %v2204_v19  ;;  %1780 = vmatpush.msk.msrb.mxu1 %vm563_vm5, %v2690_v46 }
 0x1ec   :  { %907 = vmatpush.msrb.mxu0 %v3178_v63  ;;  %968 = vmatpush.msrb.mxu3 %v2185_v12 }
 0x1ed   :  { %945 = vmatpush.msra.mxu2 %v2219_v21  ;;  %1022 = vmatpush.msrb.mxu1 %v1774_v60 }
 0x1ee   :  { %908 = vmatpush.msrb.mxu0 %v3179_v11  ;;  %969 = vmatpush.msrb.mxu3 %v2199_v16 }
 0x1ef   :  { %946 = vmatpush.msra.mxu2 %v2233_v23  ;;  %1023 = vmatpush.msrb.mxu1 %v1771_v53 }
 0x1f0   :  { %909 = vmatpush.msrb.mxu0 %v3180_v4  ;;  %970 = vmatpush.msrb.mxu3 %v2213_v20 }
 0x1f1   :  { %947 = vmatpush.msra.mxu2 %v2247_v26  ;;  %1024 = vmatpush.msrb.mxu1 %v1768_v28 }
 0x1f2   :  { %910 = vmatpush.msrb.mxu0 %v3181_v8  ;;  %971 = vmatpush.msrb.mxu3 %v2227_v22 }
 0x1f3   :  { %948 = vmatpush.msra.mxu2 %v3175_v3 }
 0x1f4   :  { %972 = vmatpush.msrb.mxu3 %v3174_v62  ;;  %1784 = vmatpush.msk.msra.mxu0 %vm563_vm5, %v2698_v51  ;;  %v1765_v62 = vld [vmem:[%s3147_s3 + $0x180] sm:$0xff] }
 0x1f5   :  { %949 = vmatpush.msra.mxu2 %v3177_v10  ;;  %1025 = vmatpush.msrb.mxu1 %v1765_v62 }
 0x1f6   :  { %973 = vmatpush.msrb.mxu3 %v3176_v7  ;;  %1062 = vmatpush.msra.mxu0 %v1776_v47  ;;  %v1766_v7 = vld [vmem:[%s3147_s3 + $0x188] sm:$0xff] }
 0x1f7   :  { %950 = vmatpush.msra.mxu2 %v3178_v63 }
 0x1f8   :  { %1782 = vmatpush.msk.msra.mxu3 %vm563_vm5, %v1778_v50  ;;  %1063 = vmatpush.msra.mxu0 %v1773_v0 }
 0x1f9   :  { %951 = vmatpush.msra.mxu2 %v3179_v11 }
 0x1fa   :  { %1042 = vmatpush.msra.mxu3 %v1775_v37  ;;  %1064 = vmatpush.msra.mxu0 %v1770_v35 }
 0x1fb   :  { %952 = vmatpush.msra.mxu2 %v3180_v4 }
 0x1fc   :  { %1043 = vmatpush.msra.mxu3 %v1772_v44 }
 0x1fd   :  { %953 = vmatpush.msra.mxu2 %v3181_v8 }
 0x1fe   :  { %1044 = vmatpush.msra.mxu3 %v1769_v27 }
 0x1ff   :  { %1788 = vmatpush.msk.msrb.mxu2 %vm563_vm5, %v1778_v50  ;;  %v1759_v50 = vld [vmem:[%s3147_s3 + $0x150] sm:$0xff] }
 0x200   :  { %1045 = vmatpush.msra.mxu3 %v1766_v7 }
 0x201   :  { %1105 = vmatpush.msrb.mxu2 %v1775_v37  ;;  %v1761_v37 = vld [vmem:[%s3147_s3 + $0x160] sm:$0xff] }
 0x203   :  { %1106 = vmatpush.msrb.mxu2 %v1772_v44 }
 0x205   :  { %1107 = vmatpush.msrb.mxu2 %v1769_v27 }
 0x207   :  { %1108 = vmatpush.msrb.mxu2 %v1766_v7  ;;  %v1817_v7 = vld [vmem:[%s3147_s3 + $0x278] sm:$0xff] }
 0x231   :  { %v610_v12 = vpop.f32.mrf.mxu1 }
 0x232   :  { %v673_v15 = vpop.f32.mrf.mxu0 }
 0x237   :  { %v590_v16 = vpop.f32.mrf.mxu3 }
 0x238   :  { %v630_v19 = vpop.f32.mrf.mxu2 }
 0x23a   :  { %v693_v20 = vpop.f32.mrf.mxu1 }
 0x23c   :  { %v765_v21 = vpop.f32.mrf.mxu0 }
 0x23d   :  { %v2677_v22 = vadd.f32 %v765_v21, %v630_v19 }
 0x240   :  { %v653_v32 = vpop.f32.mrf.mxu3 }
 0x241   :  { %v725_v52 = vpop.f32.mrf.mxu2 }
 0x242   :  { %v2679_v25 = vadd.f32 %v725_v52, %v590_v16 }
 0x243   :  { %v788_v39 = vpop.f32.mrf.mxu1 }
 0x244   :  { %v2681_v59 = vadd.f32 %v788_v39, %v653_v32 }
 0x248   :  { %v745_v61 = vpop.f32.mrf.mxu3 }
 0x249   :  { %v2683_v6 = vadd.f32 %v745_v61, %v610_v12  ;;  %v1762_v61 = vld [vmem:[%s3147_s3 + $0x168] sm:$0xff] }
 0x24a   :  { %1026 = vmatpush.msrb.mxu1 %v1762_v61 }
 0x24b   :  { %v808_v40 = vpop.f32.mrf.mxu2  ;;  %v845_v45 = vpop.f32.mrf.mxu0 }
 0x24c   :  { %v2685_v41 = vadd.f32 %v808_v40, %v673_v15  ;;  %v888_v58 = vmax.f32 %v845_v45, 0.0  ;;  %v1767_v15 = vld [vmem:[%s3147_s3 + $0x190] sm:$0xff]  ;;  %v1764_v45 = vld [vmem:[%s3147_s3 + $0x178] sm:$0xff]  ;;  %1027 = vmatpush.msrb.mxu1 %v1759_v50 }
 0x24d   :  { %1065 = vmatpush.msra.mxu0 %v1767_v15  ;;  %v1763_v40 = vld [vmem:[%s3147_s3 + $0x170] sm:$0xff] }
 0x24e   :  { %911 = vmatmul.f32.vlgmr.msrb.gmra.mxu0 %v888_v58  ;;  %1046 = vmatpush.msra.mxu3 %v1763_v40  ;;  %v1760_v58 = vld [vmem:[%s3147_s3 + $0x158] sm:$0xff] }
 0x24f   :  { %1066 = vmatpush.msra.mxu0 %v1764_v45  ;;  %1109 = vmatpush.msrb.mxu2 %v1763_v40  ;;  %v1804_v40 = vld [vmem:[%s3147_s3 + $0x210] sm:$0xff] }
 0x250   :  { %1047 = vmatpush.msra.mxu3 %v1760_v58 }
 0x251   :  { %1067 = vmatpush.msra.mxu0 %v1761_v37  ;;  %1110 = vmatpush.msrb.mxu2 %v1760_v58 }
 0x253   :  { %v847_v12 = vpop.f32.mrf.mxu0  ;;  %1149 = vmatpush.bf16.msrb.mxu0 %v2037_v38 }
 0x254   :  { %v828_v33 = vpop.f32.mrf.mxu3  ;;  %v1818_v12 = vld [vmem:[%s3147_s3 + $0x280] sm:$0xff] }
 0x255   :  { %v2727_v5 = vadd.f32 %v828_v33, %v693_v20  ;;  %v858_v31 = vpop.f32.mrf.mxu1 }
 0x256   :  { %v889_v34 = vmax.f32 %v858_v31, 0.0 }
 0x257   :  { %1150 = vmatpush.bf16.msrb.mxu0 %v2070_v49  ;;  %v1865_v49 = vld [vmem:[%s3146_s2 + $0x60] sm:$0xff] }
 0x258   :  { %1756 = vmatmul.msk.f32.vlgmr.msra.gmra.mxu1 %vm278_vm4, %v889_v34 }
 0x259   :  { %1786 = vmatpush.msk.msra.mxu1 %vm563_vm5, %v2690_v46  ;;  %v1883_v46 = vld [vmem:[%s3146_s2 + $0x18] sm:$0xff] }
 0x25b   :  { %1085 = vmatpush.msra.mxu1 %v1774_v60  ;;  %1151 = vmatpush.bf16.msrb.mxu0 %v2094_v57  ;;  %v1871_v57 = vld [vmem:[%s3146_s2 + $0xb8] sm:$0xff]  ;;  %v1885_v60 = vld [vmem:[%s3146_s2 + $0x8] sm:$0xff] }
 0x25d   :  { %v860_v16 = vpop.f32.mrf.mxu1  ;;  %1086 = vmatpush.msra.mxu1 %v1771_v53 }
 0x25e   :  { %v1814_v16 = vld [vmem:[%s3147_s3 + $0x260] sm:$0xff] }
 0x25f   :  { %1087 = vmatpush.msra.mxu1 %v1768_v28  ;;  %1152 = vmatpush.bf16.msrb.mxu0 %v2127_v2  ;;  %v1873_v2 = vld [vmem:[%s3146_s2 + $0xa8] sm:$0xff] }
 0x260   :  { %v871_v19 = vpop.f32.mrf.mxu2 }
 0x261   :  { %v890_v20 = vmax.f32 %v871_v19, 0.0  ;;  %1088 = vmatpush.msra.mxu1 %v1765_v62  ;;  %v1815_v19 = vld [vmem:[%s3147_s3 + $0x268] sm:$0xff] }
 0x263   :  { %954 = vmatmul.f32.vlgmr.msra.gmra.mxu2 %v890_v20  ;;  %1089 = vmatpush.msra.mxu1 %v1762_v61  ;;  %v1810_v20 = vld [vmem:[%s3147_s3 + $0x240] sm:$0xff]  ;;  %v1809_v61 = vld [vmem:[%s3147_s3 + $0x238] sm:$0xff] }
 0x264   :  { %1175 = vmatpush.bf16.msra.mxu2 %v1971_v13  ;;  %1153 = vmatpush.bf16.msrb.mxu0 %v2164_v9  ;;  %v1874_v9 = vld [vmem:[%s3146_s2 + $0xa0] sm:$0xff] }
 0x265   :  { %1090 = vmatpush.msra.mxu1 %v1759_v50 }
 0x268   :  { %v873_v21 = vpop.f32.mrf.mxu2  ;;  %v884_v32 = vpop.f32.mrf.mxu3  ;;  %1176 = vmatpush.bf16.msra.mxu2 %v1983_v17 }
 0x269   :  { %v891_v52 = vmax.f32 %v884_v32, 0.0  ;;  %v1811_v21 = vld [vmem:[%s3147_s3 + $0x248] sm:$0xff]  ;;  %v1812_v32 = vld [vmem:[%s3147_s3 + $0x250] sm:$0xff] }
 0x26b   :  { %1758 = vmatmul.msk.f32.vlgmr.msrb.gmra.mxu3 %vm278_vm4, %v891_v52  ;;  %v1807_v52 = vld [vmem:[%s3147_s3 + $0x228] sm:$0xff] }
 0x26c   :  { %1790 = vmatpush.msk.msrb.mxu3 %vm563_vm5, %v2698_v51  ;;  %1177 = vmatpush.bf16.msra.mxu2 %v2015_v29  ;;  %v1862_v29 = vld [vmem:[%s3146_s2 + $0x78] sm:$0xff]  ;;  %v1884_v51 = vld [vmem:[%s3146_s2 + $0x10] sm:$0xff] }
 0x26e   :  { %1125 = vmatpush.msrb.mxu3 %v1776_v47  ;;  %v1886_v47 = vld [vmem:[%s3146_s2] sm:$0xff] }
 0x270   :  { %v886_v39 = vpop.f32.mrf.mxu3  ;;  %1126 = vmatpush.msrb.mxu3 %v1773_v0  ;;  %1178 = vmatpush.bf16.msra.mxu2 %v2050_v42  ;;  %v1863_v42 = vld [vmem:[%s3146_s2 + $0x70] sm:$0xff] }
 0x271   :  { %v1808_v39 = vld [vmem:[%s3147_s3 + $0x230] sm:$0xff] }
 0x272   :  { %1127 = vmatpush.msrb.mxu3 %v1770_v35  ;;  %v2898_v35 = vld [vmem:[%s3147_s3 + $0x288] sm:$0x1] }
 0x274   :  { %1128 = vmatpush.msrb.mxu3 %v1767_v15  ;;  %1179 = vmatpush.bf16.msra.mxu2 %v2086_v54  ;;  %v1813_v15 = vld [vmem:[%s3147_s3 + $0x258] sm:$0xff] }
 0x276   :  { %1129 = vmatpush.msrb.mxu3 %v1764_v45  ;;  %v1805_v45 = vld [vmem:[%s3147_s3 + $0x218] sm:$0xff] }
 0x278   :  { %1130 = vmatpush.msrb.mxu3 %v1761_v37 }
 0x2cb   :  { %v912_v13 = vpop.f32.mrf.mxu0 }
 0x2d5   :  { %v932_v17 = vpop.f32.mrf.mxu1 }
 0x2d6   :  { %v933_v38 = vadd.f32 %v932_v17, %v912_v13 }
 0x2d8   :  { %1781 = vmatmul.msk.f32.vlgmr.msrb.gmra.mxu1 %vm559_vm6, %v933_v38  ;;  %1783 = vmatmul.msk.f32.vlgmr.msra.gmra.mxu3 %vm559_vm6, %v933_v38 }
 0x2d9   :  { %1785 = vmatmul.msk.f32.vlgmr.msra.gmra.mxu0 %vm559_vm6, %v933_v38  ;;  %1162 = vmatpush.bf16.msrb.mxu1 %v1999_v24  ;;  %v1792_v24 = vld [vmem:[%s3145_s1 + $0x3] sm:$0x1] }
 0x2da   :  { %1188 = vmatpush.bf16.msra.mxu3 %v1973_v14  ;;  %1205 = vmatpush.msra.mxu0 %v1862_v29  ;;  %v1864_v14 = vld [vmem:[%s3146_s2 + $0x68] sm:$0xff] }
 0x2dc   :  { %1206 = vmatpush.msra.mxu0 %v1863_v42 }
 0x2dd   :  { %1163 = vmatpush.bf16.msrb.mxu1 %v2032_v36  ;;  %v1867_v36 = vld [vmem:[%s3146_s2 + $0x50] sm:$0xff] }
 0x2de   :  { %1189 = vmatpush.bf16.msra.mxu3 %v1985_v18  ;;  %1207 = vmatpush.msra.mxu0 %v1864_v14  ;;  %v1866_v18 = vld [vmem:[%s3146_s2 + $0x58] sm:$0xff] }
 0x2e0   :  { %1208 = vmatpush.msra.mxu0 %v1865_v49 }
 0x2e1   :  { %1164 = vmatpush.bf16.msrb.mxu1 %v2068_v48  ;;  %1793 = vmatmul.msk.bf16.vlgmr.msrb.gmra.mxu0 %vm154_vm3, %v1792_v24  ;;  %v1868_v48 = vld [vmem:[%s3146_s2 + $0x48] sm:$0xff] }
 0x2e2   :  { %1190 = vmatpush.bf16.msra.mxu3 %v2017_v30  ;;  %1209 = vmatpush.msra.mxu0 %v1866_v18  ;;  %v1869_v30 = vld [vmem:[%s3146_s2 + $0x40] sm:$0xff] }
 0x2e4   :  { %1210 = vmatpush.msra.mxu0 %v1867_v36 }
 0x2e5   :  { %1165 = vmatpush.bf16.msrb.mxu1 %v2092_v56 }
 0x2e6   :  { %1191 = vmatpush.bf16.msra.mxu3 %v2052_v43  ;;  %1211 = vmatpush.msra.mxu0 %v1868_v48  ;;  %v955_v54 = vpop.f32.mrf.mxu2 }
 0x2e8   :  { %1212 = vmatpush.msra.mxu0 %v1869_v30 }
 0x2e9   :  { %1166 = vmatpush.bf16.msrb.mxu1 %v2125_v1  ;;  %v1872_v1 = vld [vmem:[%s3146_s2 + $0xb0] sm:$0xff] }
 0x2ea   :  { %1192 = vmatpush.bf16.msra.mxu3 %v2088_v55  ;;  %1213 = vmatpush.msra.mxu0 %v2233_v23  ;;  %v1870_v55 = vld [vmem:[%s3146_s2 + $0xc0] sm:$0xf]  ;;  %v1875_v23 = vld [vmem:[%s3146_s2 + $0x98] sm:$0xff] }
 0x2ec   :  { %1214 = vmatpush.msra.mxu0 %v2247_v26  ;;  %v1876_v26 = vld [vmem:[%s3146_s2 + $0x90] sm:$0xff] }
 0x2ee   :  { %v975_v43 = vpop.f32.mrf.mxu3  ;;  %1215 = vmatpush.msra.mxu0 %v3175_v3  ;;  %v1877_v3 = vld [vmem:[%s3146_s2 + $0x38] sm:$0xff] }
 0x2ef   :  { %v976_v56 = vadd.f32 %v975_v43, %v955_v54  ;;  %v1803_v54 = vld [vmem:[%s3147_s3 + $0x208] sm:$0xff]  ;;  %v82_v43 = vld [vmem:[%s3148_s4 + $0x78] sm:$0xff] }
 0x2f0   :  { %1216 = vmatpush.msra.mxu0 %v3177_v10  ;;  %v1878_v10 = vld [vmem:[%s3146_s2 + $0x88] sm:$0xff] }
 0x2f1   :  { %1787 = vmatmul.msk.f32.vlgmr.msra.gmra.mxu1 %vm559_vm6, %v976_v56  ;;  %1789 = vmatmul.msk.f32.vlgmr.msrb.gmra.mxu2 %vm559_vm6, %v976_v56 }
 0x2f2   :  { %1791 = vmatmul.msk.f32.vlgmr.msrb.gmra.mxu3 %vm559_vm6, %v976_v56  ;;  %1248 = vmatpush.msrb.mxu2 %v1862_v29  ;;  %v81_v56 = vld [vmem:[%s3148_s4 + $0x70] sm:$0xff] }
 0x2f3   :  { %1797 = vmatpush.msk.msra.mxu1 %vm282_vm2, %v1870_v55  ;;  %1799 = vmatpush.msk.msrb.mxu3 %vm282_vm2, %v1870_v55  ;;  %v2996_v55 = vld [vmem:[%s3148_s4 + $0x128] sm:$0xf] }
 0x2f4   :  { %1249 = vmatpush.msrb.mxu2 %v1863_v42  ;;  %1217 = vmatpush.msra.mxu0 %v3178_v63  ;;  %v1879_v63 = vld [vmem:[%s3146_s2 + $0x30] sm:$0xff] }
 0x2f5   :  { %1233 = vmatpush.msra.mxu1 %v1871_v57  ;;  %1276 = vmatpush.msrb.mxu3 %v1871_v57  ;;  %v80_v57 = vld [vmem:[%s3148_s4 + $0x68] sm:$0xff] }
 0x2f6   :  { %1250 = vmatpush.msrb.mxu2 %v1864_v14  ;;  %1218 = vmatpush.msra.mxu0 %v3179_v11  ;;  %v1880_v11 = vld [vmem:[%s3146_s2 + $0x80] sm:$0xff] }
 0x2f7   :  { %1234 = vmatpush.msra.mxu1 %v1872_v1  ;;  %1277 = vmatpush.msrb.mxu3 %v1872_v1  ;;  %v3006_v1 = vld [vmem:[%s3148_s4 + $0x120] sm:$0xff] }
 0x2f8   :  { %1251 = vmatpush.msrb.mxu2 %v1865_v49  ;;  %1219 = vmatpush.msra.mxu0 %v3180_v4  ;;  %v1881_v4 = vld [vmem:[%s3146_s2 + $0x28] sm:$0xff] }
 0x2f9   :  { %1794 = vmatmul.msk.bf16.vlgmr.msrb.gmra.mxu1 %vm154_vm3, %v1792_v24  ;;  %1795 = vmatmul.msk.bf16.vlgmr.msra.gmra.mxu2 %vm154_vm3, %v1792_v24 }
 0x2fa   :  { %1796 = vmatmul.msk.bf16.vlgmr.msra.gmra.mxu3 %vm154_vm3, %v1792_v24  ;;  %1252 = vmatpush.msrb.mxu2 %v1866_v18 }
 0x2fb   :  { %1235 = vmatpush.msra.mxu1 %v1873_v2  ;;  %1278 = vmatpush.msrb.mxu3 %v1873_v2  ;;  %v3011_v2 = vld [vmem:[%s3148_s4 + $0x118] sm:$0xff] }
 0x2fc   :  { %1253 = vmatpush.msrb.mxu2 %v1867_v36  ;;  %1220 = vmatpush.msra.mxu0 %v3181_v8  ;;  %v1882_v8 = vld [vmem:[%s3146_s2 + $0x20] sm:$0xff] }
 0x2fd   :  { %1236 = vmatpush.msra.mxu1 %v1874_v9  ;;  %1279 = vmatpush.msrb.mxu3 %v1874_v9  ;;  %v79_v9 = vld [vmem:[%s3148_s4 + $0x60] sm:$0xff] }
 0x2fe   :  { %1254 = vmatpush.msrb.mxu2 %v1868_v48 }
 0x2ff   :  { %1237 = vmatpush.msra.mxu1 %v1875_v23  ;;  %1280 = vmatpush.msrb.mxu3 %v1875_v23  ;;  %v3020_v23 = vld [vmem:[%s3148_s4 + $0x110] sm:$0xff] }
 0x300   :  { %1255 = vmatpush.msrb.mxu2 %v1869_v30  ;;  %v1802_v30 = vld [vmem:[%s3147_s3 + $0x200] sm:$0xff] }
 0x301   :  { %1238 = vmatpush.msra.mxu1 %v1876_v26  ;;  %1281 = vmatpush.msrb.mxu3 %v1876_v26  ;;  %v78_v26 = vld [vmem:[%s3148_s4 + $0x58] sm:$0xff] }
 0x302   :  { %1256 = vmatpush.msrb.mxu2 %v1877_v3  ;;  %v3029_v3 = vld [vmem:[%s3148_s4 + $0x108] sm:$0xff] }
 0x303   :  { %1239 = vmatpush.msra.mxu1 %v1878_v10  ;;  %1282 = vmatpush.msrb.mxu3 %v1878_v10  ;;  %v77_v10 = vld [vmem:[%s3148_s4 + $0x50] sm:$0xff] }
 0x304   :  { %1257 = vmatpush.msrb.mxu2 %v1879_v63  ;;  %v3038_v63 = vld [vmem:[%s3148_s4 + $0x100] sm:$0xff] }
 0x305   :  { %1240 = vmatpush.msra.mxu1 %v1880_v11  ;;  %1283 = vmatpush.msrb.mxu3 %v1880_v11  ;;  %v76_v11 = vld [vmem:[%s3148_s4 + $0x48] sm:$0xff] }
 0x306   :  { %1258 = vmatpush.msrb.mxu2 %v1881_v4  ;;  %v75_v4 = vld [vmem:[%s3148_s4 + $0x40] sm:$0xff] }
 0x307   :  { %1822 = vmatpush.msk.msrb.mxu1 %vm563_vm5, %v2898_v35 }
 0x308   :  { %1259 = vmatpush.msrb.mxu2 %v1882_v8 }
 0x30a   :  { %1260 = vmatpush.msrb.mxu2 %v1883_v46  ;;  %v74_v46 = vld [vmem:[%s3148_s4 + $0x38] sm:$0xff] }
 0x30c   :  { %1261 = vmatpush.msrb.mxu2 %v1884_v51 }
 0x30e   :  { %1262 = vmatpush.msrb.mxu2 %v1885_v60 }
 0x310   :  { %1263 = vmatpush.msrb.mxu2 %v1886_v47  ;;  %v98_v47 = vld [vmem:[%s3148_s4 + $0xf8] sm:$0xff] }
 0x355   :  { %v1029_v53 = vpop.f32.mrf.mxu1 }
 0x356   :  { %v2887_v44 = vadd.f32 %v1029_v53, %v2679_v25  ;;  %v1069_v0 = vpop.f32.mrf.mxu0  ;;  %v1820_v25 = vld [vmem:[%s3147_s3 + $0x290] sm:$0x1] }
 0x357   :  { %v2890_v33 = vadd.f32 %v1069_v0, %v2677_v22  ;;  %v2906_v22 = vld [vmem:[%s3147_s3 + $0x298] sm:$0x1]  ;;  %1824 = vmatpush.msk.msra.mxu3 %vm563_vm5, %v1820_v25  ;;  %1830 = vmatpush.msk.msra.mxu2 %vm563_vm5, %v1820_v25  ;;  %v73_v53 = vld [vmem:[%s3148_s4 + $0x30] sm:$0xff] }
 0x358   :  { %1826 = vmatpush.msk.msrb.mxu0 %vm563_vm5, %v2906_v22  ;;  %v97_v0 = vld [vmem:[%s3148_s4 + $0xf0] sm:$0xff]  ;;  %v70_v25 = vld [vmem:[%s3148_s4 + $0x18] sm:$0xff] }
 0x359   :  { %1352 = vmatpush.msra.mxu3 %v1817_v7  ;;  %1415 = vmatpush.msra.mxu2 %v1817_v7 }
 0x35a   :  { %1372 = vmatpush.msrb.mxu0 %v1818_v12 }
 0x35b   :  { %v1049_v28 = vpop.f32.mrf.mxu3  ;;  %1353 = vmatpush.msra.mxu3 %v1814_v16  ;;  %1416 = vmatpush.msra.mxu2 %v1814_v16  ;;  %v91_v16 = vld [vmem:[%s3148_s4 + $0xc0] sm:$0xff] }
 0x35c   :  { %v2893_v31 = vadd.f32 %v1049_v28, %v2683_v6  ;;  %v2914_v6 = vld [vmem:[%s3147_s3 + $0x270] sm:$0xff]  ;;  %1373 = vmatpush.msrb.mxu0 %v1815_v19  ;;  %v72_v28 = vld [vmem:[%s3148_s4 + $0x28] sm:$0xff] }
 0x35d   :  { %1332 = vmatpush.msrb.mxu1 %v2914_v6  ;;  %1354 = vmatpush.msra.mxu3 %v1811_v21 }
 0x35e   :  { %v1155_v27 = vpop.f32.mrf.mxu0  ;;  %1374 = vmatpush.msrb.mxu0 %v1812_v32  ;;  %1417 = vmatpush.msra.mxu2 %v1811_v21  ;;  %v69_v21 = vld [vmem:[%s3148_s4 + $0x10] sm:$0xff] }
 0x35f   :  { %v1198_v34 = vmax.f32 %v1155_v27, 0.0  ;;  %1333 = vmatpush.msrb.mxu1 %v1813_v15  ;;  %1355 = vmatpush.msra.mxu3 %v1808_v39  ;;  %v96_v27 = vld [vmem:[%s3148_s4 + $0xe8] sm:$0xff] }
 0x360   :  { %1375 = vmatpush.msrb.mxu0 %v1809_v61  ;;  %1418 = vmatpush.msra.mxu2 %v1808_v39  ;;  %v87_v39 = vld [vmem:[%s3148_s4 + $0xa0] sm:$0xff] }
 0x361   :  { %1221 = vmatmul.f32.vlgmr.msra.gmra.mxu0 %v1198_v34  ;;  %1334 = vmatpush.msrb.mxu1 %v1810_v20  ;;  %v71_v34 = vld [vmem:[%s3148_s4 + $0x20] sm:$0xff] }
 0x362   :  { %1356 = vmatpush.msra.mxu3 %v1805_v45  ;;  %1419 = vmatpush.msra.mxu2 %v1805_v45  ;;  %v85_v45 = vld [vmem:[%s3148_s4 + $0x90] sm:$0xff] }
 0x363   :  { %1335 = vmatpush.msrb.mxu1 %v1807_v52 }
 0x364   :  { %1357 = vmatpush.msra.mxu3 %v1802_v30  ;;  %1420 = vmatpush.msra.mxu2 %v1802_v30 }
 0x365   :  { %1336 = vmatpush.msrb.mxu1 %v1804_v40 }
 0x366   :  { %v1157_v62 = vpop.f32.mrf.mxu0 }
 0x367   :  { %v93_v62 = vld [vmem:[%s3148_s4 + $0xd0] sm:$0xff] }
 0x36e   :  { %v1092_v50 = vpop.f32.mrf.mxu1 }
 0x36f   :  { %v2960_v58 = vadd.f32 %v1092_v50, %v2681_v59  ;;  %v84_v50 = vld [vmem:[%s3148_s4 + $0x88] sm:$0xff] }
 0x374   :  { %v1112_v37 = vpop.f32.mrf.mxu2 }
 0x375   :  { %v2963_v13 = vadd.f32 %v1112_v37, %v2685_v41  ;;  %v1132_v17 = vpop.f32.mrf.mxu3  ;;  %v1806_v41 = vld [vmem:[%s3147_s3 + $0x220] sm:$0xff] }
 0x376   :  { %v2966_v38 = vadd.f32 %v1132_v17, %v2727_v5  ;;  %v1168_v29 = vpop.f32.mrf.mxu1  ;;  %1376 = vmatpush.msrb.mxu0 %v1806_v41  ;;  %v1801_v5 = vld [vmem:[%s3147_s3 + $0x1f8] sm:$0xff]  ;;  %v83_v37 = vld [vmem:[%s3148_s4 + $0x80] sm:$0xff] }
 0x377   :  { %v1199_v42 = vmax.f32 %v1168_v29, 0.0  ;;  %1337 = vmatpush.msrb.mxu1 %v1801_v5 }
 0x378   :  { %1377 = vmatpush.msrb.mxu0 %v1803_v54 }
 0x379   :  { %1798 = vmatmul.msk.f32.vlgmr.msra.gmra.mxu1 %vm278_vm4, %v1199_v42 }
 0x37a   :  { %1828 = vmatpush.msk.msra.mxu1 %vm563_vm5, %v2898_v35  ;;  %1464 = vmatpush.msra.mxu0 %v82_v43  ;;  %v95_v35 = vld [vmem:[%s3148_s4 + $0xe0] sm:$0xff] }
 0x37c   :  { %v1181_v24 = vpop.f32.mrf.mxu2  ;;  %1395 = vmatpush.msra.mxu1 %v2914_v6  ;;  %1465 = vmatpush.msra.mxu0 %v81_v56 }
 0x37d   :  { %v1200_v59 = vmax.f32 %v1181_v24, 0.0  ;;  %v1194_v14 = vpop.f32.mrf.mxu3 }
 0x37e   :  { %v1201_v49 = vmax.f32 %v1194_v14, 0.0  ;;  %v1170_v18 = vpop.f32.mrf.mxu1  ;;  %1396 = vmatpush.msra.mxu1 %v1813_v15  ;;  %1466 = vmatpush.msra.mxu0 %v80_v57  ;;  %v92_v15 = vld [vmem:[%s3148_s4 + $0xc8] sm:$0xff] }
 0x37f   :  { %1264 = vmatmul.f32.vlgmr.msrb.gmra.mxu2 %v1200_v59 }
 0x380   :  { %1800 = vmatmul.msk.f32.vlgmr.msrb.gmra.mxu3 %vm278_vm4, %v1201_v49  ;;  %1397 = vmatpush.msra.mxu1 %v1810_v20  ;;  %v89_v20 = vld [vmem:[%s3148_s4 + $0xb0] sm:$0xff] }
 0x381   :  { %1832 = vmatpush.msk.msrb.mxu3 %vm563_vm5, %v2906_v22  ;;  %1834 = vmatpush.msk.msrb.mxu2 %vm282_vm2, %v2996_v55  ;;  %v94_v22 = vld [vmem:[%s3148_s4 + $0xd8] sm:$0xff] }
 0x382   :  { %1398 = vmatpush.msra.mxu1 %v1807_v52  ;;  %1467 = vmatpush.msra.mxu0 %v79_v9  ;;  %v68_v52 = vld [vmem:[%s3148_s4 + $0x8] sm:$0xff] }
 0x383   :  { %1435 = vmatpush.msrb.mxu3 %v1818_v12  ;;  %1515 = vmatpush.msrb.mxu2 %v3006_v1 }
 0x384   :  { %v1183_v36 = vpop.f32.mrf.mxu2  ;;  %1399 = vmatpush.msra.mxu1 %v1804_v40  ;;  %1468 = vmatpush.msra.mxu0 %v78_v26  ;;  %v86_v40 = vld [vmem:[%s3148_s4 + $0x98] sm:$0xff] }
 0x385   :  { %v1196_v48 = vpop.f32.mrf.mxu3  ;;  %1436 = vmatpush.msrb.mxu3 %v1815_v19  ;;  %1516 = vmatpush.msrb.mxu2 %v3011_v2  ;;  %v90_v19 = vld [vmem:[%s3148_s4 + $0xb8] sm:$0xff] }
 0x386   :  { %1400 = vmatpush.msra.mxu1 %v1801_v5  ;;  %1469 = vmatpush.msra.mxu0 %v77_v10 }
 0x387   :  { %1437 = vmatpush.msrb.mxu3 %v1812_v32  ;;  %1517 = vmatpush.msrb.mxu2 %v3020_v23  ;;  %v88_v32 = vld [vmem:[%s3148_s4 + $0xa8] sm:$0xff] }
 0x388   :  { %1470 = vmatpush.msra.mxu0 %v76_v11 }
 0x389   :  { %1438 = vmatpush.msrb.mxu3 %v1809_v61  ;;  %1518 = vmatpush.msrb.mxu2 %v3029_v3  ;;  %v67_v61 = vld [vmem:[%s3148_s4] sm:$0xff]  ;;  %s1914_s4 = smov [#allocation2]  }
 0x38a   :  { %1471 = vmatpush.msra.mxu0 %v75_v4  ;;  %s1594_s23 = sshll.u32 %s1914_s4, 4  ;;  %s1595_s23 = int_to_ptr.vmem [resolvable:$true] %s1594_s23 }
 0x38b   :  { %1439 = vmatpush.msrb.mxu3 %v1806_v41  ;;  %1519 = vmatpush.msrb.mxu2 %v3038_v63 }
 0x38c   :  { %1472 = vmatpush.msra.mxu0 %v74_v46 }
 0x38d   :  { %1440 = vmatpush.msrb.mxu3 %v1803_v54 }
 0x38e   :  { %1473 = vmatpush.msra.mxu0 %v73_v53 }
 0x390   :  { %1474 = vmatpush.msra.mxu0 %v72_v28 }
 0x392   :  { %1475 = vmatpush.msra.mxu0 %v71_v34 }
 0x394   :  { %1476 = vmatpush.msra.mxu0 %v70_v25 }
 0x396   :  { %1477 = vmatpush.msra.mxu0 %v69_v21 }
 0x398   :  { %1478 = vmatpush.msra.mxu0 %v68_v52 }
 0x39a   :  { %1479 = vmatpush.msra.mxu0 %v67_v61 }
 0x3de   :  { %v1222_v8 = vpop.f32.mrf.mxu0 }
 0x3f6   :  { %v1242_v51 = vpop.f32.mrf.mxu1 }
 0x3f7   :  { %v1243_v60 = vadd.f32 %v1242_v51, %v1222_v8 }
 0x3f9   :  { %1823 = vmatmul.msk.f32.vlgmr.msrb.gmra.mxu1 %vm559_vm6, %v1243_v60  ;;  %1825 = vmatmul.msk.f32.vlgmr.msra.gmra.mxu3 %vm559_vm6, %v1243_v60 }
 0x3fa   :  { %1827 = vmatmul.msk.f32.vlgmr.msrb.gmra.mxu0 %vm559_vm6, %v1243_v60  ;;  %1484 = vmatpush.msrb.mxu1 %v98_v47 }
 0x3fb   :  { %1527 = vmatpush.msra.mxu3 %v82_v43  ;;  %1836 = vmatpush.msk.msrb.mxu0 %vm282_vm2, %v2996_v55 }
 0x3fc   :  { %1485 = vmatpush.msrb.mxu1 %v97_v0 }
 0x3fd   :  { %1528 = vmatpush.msra.mxu3 %v81_v56  ;;  %1578 = vmatpush.msrb.mxu0 %v3006_v1 }
 0x3fe   :  { %1486 = vmatpush.msrb.mxu1 %v96_v27 }
 0x3ff   :  { %1529 = vmatpush.msra.mxu3 %v80_v57  ;;  %1579 = vmatpush.msrb.mxu0 %v3011_v2 }
 0x400   :  { %1487 = vmatpush.msrb.mxu1 %v95_v35 }
 0x401   :  { %1530 = vmatpush.msra.mxu3 %v79_v9  ;;  %1580 = vmatpush.msrb.mxu0 %v3020_v23 }
 0x402   :  { %v1265_v6 = vpop.f32.mrf.mxu2  ;;  %1488 = vmatpush.msrb.mxu1 %v94_v22 }
 0x403   :  { %v1285_v7 = vpop.f32.mrf.mxu3  ;;  %1531 = vmatpush.msra.mxu3 %v78_v26  ;;  %1581 = vmatpush.msrb.mxu0 %v3029_v3 }
 0x404   :  { %v1286_v12 = vadd.f32 %v1285_v7, %v1265_v6  ;;  %1489 = vmatpush.msrb.mxu1 %v93_v62 }
 0x405   :  { %1532 = vmatpush.msra.mxu3 %v77_v10  ;;  %1582 = vmatpush.msrb.mxu0 %v3038_v63 }
 0x406   :  { %1829 = vmatmul.msk.f32.vlgmr.msra.gmra.mxu1 %vm559_vm6, %v1286_v12  ;;  %1831 = vmatmul.msk.f32.vlgmr.msra.gmra.mxu2 %vm559_vm6, %v1286_v12 }
 0x407   :  { %1833 = vmatmul.msk.f32.vlgmr.msrb.gmra.mxu3 %vm559_vm6, %v1286_v12  ;;  %1490 = vmatpush.msrb.mxu1 %v92_v15 }
 0x408   :  { %1547 = vmatpush.msra.mxu2 %v98_v47  ;;  %1533 = vmatpush.msra.mxu3 %v76_v11 }
 0x409   :  { %1491 = vmatpush.msrb.mxu1 %v91_v16 }
 0x40a   :  { %1548 = vmatpush.msra.mxu2 %v97_v0  ;;  %1534 = vmatpush.msra.mxu3 %v75_v4 }
 0x40b   :  { %1492 = vmatpush.msrb.mxu1 %v90_v19 }
 0x40c   :  { %1549 = vmatpush.msra.mxu2 %v96_v27  ;;  %1535 = vmatpush.msra.mxu3 %v74_v46 }
 0x40d   :  { %1493 = vmatpush.msrb.mxu1 %v89_v20 }
 0x40e   :  { %1550 = vmatpush.msra.mxu2 %v95_v35  ;;  %1536 = vmatpush.msra.mxu3 %v73_v53 }
 0x40f   :  { %1494 = vmatpush.msrb.mxu1 %v88_v32 }
 0x410   :  { %1551 = vmatpush.msra.mxu2 %v94_v22  ;;  %1537 = vmatpush.msra.mxu3 %v72_v28 }
 0x411   :  { %1495 = vmatpush.msrb.mxu1 %v87_v39 }
 0x412   :  { %1552 = vmatpush.msra.mxu2 %v93_v62  ;;  %1538 = vmatpush.msra.mxu3 %v71_v34 }
 0x413   :  { %1496 = vmatpush.msrb.mxu1 %v86_v40 }
 0x414   :  { %1553 = vmatpush.msra.mxu2 %v92_v15  ;;  %1539 = vmatpush.msra.mxu3 %v70_v25 }
 0x415   :  { %1497 = vmatpush.msrb.mxu1 %v85_v45 }
 0x416   :  { %1554 = vmatpush.msra.mxu2 %v91_v16  ;;  %1540 = vmatpush.msra.mxu3 %v69_v21 }
 0x417   :  { %1498 = vmatpush.msrb.mxu1 %v84_v50 }
 0x418   :  { %1555 = vmatpush.msra.mxu2 %v90_v19  ;;  %1541 = vmatpush.msra.mxu3 %v68_v52 }
 0x419   :  { %1499 = vmatpush.msrb.mxu1 %v83_v37 }
 0x41a   :  { %1556 = vmatpush.msra.mxu2 %v89_v20  ;;  %1542 = vmatpush.msra.mxu3 %v67_v61 }
 0x41c   :  { %1557 = vmatpush.msra.mxu2 %v88_v32 }
 0x41e   :  { %1558 = vmatpush.msra.mxu2 %v87_v39 }
 0x420   :  { %1559 = vmatpush.msra.mxu2 %v86_v40 }
 0x422   :  { %1560 = vmatpush.msra.mxu2 %v85_v45 }
 0x424   :  { %1561 = vmatpush.msra.mxu2 %v84_v50 }
 0x426   :  { %1562 = vmatpush.msra.mxu2 %v83_v37 }
 0x476   :  { %v1339_v17 = vpop.f32.mrf.mxu1 }
 0x477   :  { %v1445_v29 = vadd.f32 %v1339_v17, %v2887_v44  ;;  %v1379_v42 = vpop.f32.mrf.mxu0 }
 0x478   :  { %v1447_v24 = vadd.f32 %v1379_v42, %v2890_v33 }
 0x479   :  { %v1451_v59 = vmax.f32 %v1445_v29, 0.0 }
 0x47a   :  { %v1453_v14 = vmax.f32 %v1447_v24, 0.0 }
 0x47b   :  { %1480 = vmatmul.f32.vlgmr.msra.gmra.mxu0 %v1451_v59 }
 0x47c   :  { %1835 = vmatmul.msk.f32.vlgmr.msrb.gmra.mxu2 %vm1457_vm7, %v1453_v14  ;;  %v1359_v49 = vpop.f32.mrf.mxu3 }
 0x47d   :  { %v1446_v18 = vadd.f32 %v1359_v49, %v2893_v31 }
 0x47f   :  { %v1452_v36 = vmax.f32 %v1446_v18, 0.0 }
 0x481   :  { %1500 = vmatmul.f32.vlgmr.msrb.gmra.mxu1 %v1452_v36 }
 0x483   :  { %v1402_v48 = vpop.f32.mrf.mxu1 }
 0x484   :  { %v1448_v41 = vadd.f32 %v1402_v48, %v2960_v58 }
 0x486   :  { %v1454_v5 = vmax.f32 %v1448_v41, 0.0 }
 0x488   :  { %1543 = vmatmul.f32.vlgmr.msra.gmra.mxu3 %v1454_v5 }
 0x489   :  { %v1422_v44 = vpop.f32.mrf.mxu2 }
 0x48a   :  { %v1449_v30 = vadd.f32 %v1422_v44, %v2963_v13  ;;  %v1442_v33 = vpop.f32.mrf.mxu3 }
 0x48b   :  { %v1450_v54 = vadd.f32 %v1442_v33, %v2966_v38 }
 0x48c   :  { %v1455_v43 = vmax.f32 %v1449_v30, 0.0 }
 0x48d   :  { %v1456_v56 = vmax.f32 %v1450_v54, 0.0 }
 0x48e   :  { %1563 = vmatmul.f32.vlgmr.msra.gmra.mxu2 %v1455_v43 }
 0x48f   :  { %1837 = vmatmul.msk.f32.vlgmr.msrb.gmra.mxu0 %vm1457_vm7, %v1456_v56 }
 0x4f8   :  { %v1481_v55 = vpop.f32.mrf.mxu0 }
 0x4fe   :  { %v1501_v31 = vpop.f32.mrf.mxu1 }
 0x4ff   :  { %v1502_v57 = vadd.f32 %v1501_v31, %v1481_v55  ;;  %v1521_v1 = vpop.f32.mrf.mxu2 }
 0x501   :  { %v1522_v2 = vadd.f32 %v1521_v1, %v1502_v57 }
 0x503   :  { %1588 = vst.msk [vmem:[#allocation2] sm:$0x1] %vm1587_vm8, %v1522_v2 }
 0x50b   :  { %v1544_v58 = vpop.f32.mrf.mxu3 }
 0x50c   :  { %v1584_v9 = vpop.f32.mrf.mxu0 }
 0x511   :  { %v1564_v13 = vpop.f32.mrf.mxu2 }
 0x512   :  { %v1565_v38 = vadd.f32 %v1564_v13, %v1544_v58 }
 0x514   :  { %v1585_v23 = vadd.f32 %v1584_v9, %v1565_v38 }
 0x516   :  { %1589 = vst.msk [vmem:[#allocation2 + $0x1] sm:$0x1] %vm1587_vm8, %v1585_v23 }
 0x517   :  { %1602 = dma.vmem_to_hbm [thread:$0]  %s1595_s23, 32, %s1597_s26, [#allocation3], %s1915_s27, %s1915_s27, %s1916_s28  }
 0x518   :  { %1911 = dma.done.wait [#allocation3], 32  }
 0x519   :  { %1912 = vsyncadd [#allocation3], 4294967264 }
 0x51a   :  { %1607 = vsyncpa [#allocation3], 1 }

</bundles_post_ra>
